<compile_context>
chip_gen: v5e
topology: v5e:2x2
jax: 0.10.0
libtpu: 0.0.40
codegen_flags: <defaults>
</compile_context>

<pallas_src>
import jax
import jax.numpy as jnp
from jax import lax
from jax.experimental import pallas as pl
from jax.experimental.pallas import tpu as pltpu

# ----------------------- config (small synthetic sizes) -----------------------
B      = 8      # batch
D      = 128    # opt['embed']['embed_dim']
FF     = 256    # FFN mid size
D_DYN  = 64     # opt['fusion']['dynamic_fusion_dim']
LN_EPS = 1e-6   # MCAN LayerNorm eps
INV_D  = 1.0 / D


# ------------------------------- Pallas kernel --------------------------------
def fusion_midf_kernel(g_ref, l_ref,
                       wf_sa_ref, bf_sa_ref,              # stacked SA mhatt (fused)  (2,D,D)/(2,1,D)
                       w1_sa_ref, b1_sa_ref,              # stacked SA FFN layer 1
                       w2_sa_ref, b2_sa_ref,              # stacked SA FFN layer 2
                       ln_sa_g_ref, ln_sa_b_ref,          # (2 stages, 2 halves, 1, D)
                       wf_sga_ref, bf_sga_ref,            # (2 blocks, 2 steps, D, D)/(2,2,1,D)
                       w1_sga_ref, b1_sga_ref,            # (2, D, FF)/(2,1,FF)
                       w2_sga_ref, b2_sga_ref,            # (2, FF, D)/(2,1,D)
                       ln_sga_g_ref, ln_sga_b_ref,        # (2 blocks, 3 stages, 1, D)
                       dw1_ref, db1_ref,                  # dynamic_weight MLP layer 1
                       dw2c_ref,                          # folded softmax column-0 weights (1,D_DYN)
                       db2c_ref,                          # folded softmax column-0 bias, SMEM (1,1)
                       out_ref):

    def layernorm(x, gamma, beta):
        # Two independent cross-lane reductions -> issue in parallel on the XLUs.
        s1 = jnp.sum(x, axis=-1, keepdims=True)
        s2 = jnp.sum(x * x, axis=-1, keepdims=True)
        mu = s1 * INV_D
        var = s2 * INV_D - mu * mu                      # E[x^2] - (E[x])^2
        return gamma * ((x - mu) * lax.rsqrt(var + LN_EPS)) + beta

    def bdot(x, w):
        # Batched MXU matmul: x (2,M,K) -> bf16, w (2,K,N) already bf16, f32 acc.
        return lax.dot_general(x.astype(jnp.bfloat16), w,
                               dimension_numbers=(((2,), (1,)), ((0,), (0,))),
                               preferred_element_type=jnp.float32)

    def dot(x, w):
        return jnp.dot(x.astype(jnp.bfloat16), w, preferred_element_type=jnp.float32)

    # ------------- SA phase: g2g_SA(g) and l2l_SA(l), batched together -------------
    x = jnp.stack([g_ref[...], l_ref[...]], axis=0)                 # (2, B, D)
    m = bdot(x, wf_sa_ref[...]) + bf_sa_ref[...]                    # both mhatts, one pass
    x = layernorm(x + m, ln_sa_g_ref[0], ln_sa_b_ref[0])
    h = jnp.maximum(bdot(x, w1_sa_ref[...]) + b1_sa_ref[...], 0.0)  # both FFN1
    f = bdot(h, w2_sa_ref[...]) + b2_sa_ref[...]                    # both FFN2
    x = layernorm(x + f, ln_sa_g_ref[1], ln_sa_b_ref[1])
    g = x[0]
    l = x[1]

    # ------------- SGA blocks (sequential; self + cross matmuls batched) -----------
    def sga(x, y, blk):
        # m_self depends on x, m_cross depends only on y (seq_len==1) -> both are
        # computable at block entry; one batched dot covers them.
        xy = jnp.stack([x, y], axis=0)                               # (2, B, D)
        mm = bdot(xy, wf_sga_ref[blk]) + bf_sga_ref[blk]             # [m_self, m_cross]
        x = layernorm(x + mm[0], ln_sga_g_ref[blk, 0], ln_sga_b_ref[blk, 0])
        x = layernorm(x + mm[1], ln_sga_g_ref[blk, 1], ln_sga_b_ref[blk, 1])
        h = jnp.maximum(dot(x, w1_sga_ref[blk]) + b1_sga_ref[blk], 0.0)
        f = dot(h, w2_sga_ref[blk]) + b2_sga_ref[blk]
        x = layernorm(x + f, ln_sga_g_ref[blk, 2], ln_sga_b_ref[blk, 2])
        return x

    l = sga(l, g, 0)        # g2l_SGA(local, global)
    g = sga(g, l, 1)        # l2g_SGA(global, local)

    # ------------- fusion tail (matches PyTorch, incl. column-0-for-both) ----------
    g2  = jax.nn.sigmoid(l) * g         # F.sigmoid(local_t) * global_t
    l2  = g + l                         # global_t + local_t
    fgl = g2 + l2

    h = jax.nn.sigmoid(dot(fgl, dw1_ref[...]) + db1_ref[...])
    # 2-way softmax column 0 == sigmoid(logit0 - logit1); folded weights on host.
    logit = jnp.sum(h * dw2c_ref[...], axis=-1, keepdims=True) + db2c_ref[0, 0]
    w0 = jax.nn.sigmoid(logit)
    out_ref[...] = (w0 * fgl).astype(out_ref.dtype)   # w0*g2 + w0*l2 == w0*fgl


# ----------------------- host-side parameter preparation ----------------------
def prepare_params(p):
    """Fold Wv@Wm, fold the 2-way softmax, stack SA/SGA params, cast weights bf16."""
    bf16, f32 = jnp.bfloat16, jnp.float32
    wf = jnp.einsum("ijk,ikl->ijl", p["wv"], p["wm"])            # (6, D, D)
    bf = jnp.einsum("ij,ijk->ik", p["bv"], p["wm"]) + p["bm"]    # (6, D)

    # SA-phase stacking: half 0 = g (g2g_SA), half 1 = l (l2l_SA).
    ln_sa_g = jnp.stack([p["lng"][jnp.array([0, 2])],
                         p["lng"][jnp.array([1, 3])]], axis=0).reshape(2, 2, 1, D)
    ln_sa_b = jnp.stack([p["lnb"][jnp.array([0, 2])],
                         p["lnb"][jnp.array([1, 3])]], axis=0).reshape(2, 2, 1, D)

    # Folded 2-way softmax (column 0): sigmoid((w0-w1)@h + (b0-b1)).
    dw2c = (p["dw2"][:, 0] - p["dw2"][:, 1]).reshape(1, D_DYN)
    db2c = (p["db2"][:, 0] - p["db2"][:, 1]).reshape(1, 1)

    return {
        "wf_sa":   wf[0:2].astype(bf16),                         # (2, D, D)
        "bf_sa":   bf[0:2].reshape(2, 1, D).astype(f32),
        "w1_sa":   p["w1"][0:2].astype(bf16),                    # (2, D, FF)
        "b1_sa":   p["b1"][0:2].reshape(2, 1, FF).astype(f32),
        "w2_sa":   p["w2"][0:2].astype(bf16),                    # (2, FF, D)
        "b2_sa":   p["b2"][0:2].reshape(2, 1, D).astype(f32),
        "ln_sa_g": ln_sa_g.astype(f32),
        "ln_sa_b": ln_sa_b.astype(f32),
        # SGA: block 0 = g2l (self=wf[2], cross=wf[3]), block 1 = l2g (wf[4], wf[5]).
        "wf_sga":  wf[2:6].reshape(2, 2, D, D).astype(bf16),
        "bf_sga":  bf[2:6].reshape(2, 2, 1, D).astype(f32),
        "w1_sga":  p["w1"][2:4].astype(bf16),
        "b1_sga":  p["b1"][2:4].reshape(2, 1, FF).astype(f32),
        "w2_sga":  p["w2"][2:4].astype(bf16),
        "b2_sga":  p["b2"][2:4].reshape(2, 1, D).astype(f32),
        "ln_sga_g": p["lng"][4:10].reshape(2, 3, 1, D).astype(f32),
        "ln_sga_b": p["lnb"][4:10].reshape(2, 3, 1, D).astype(f32),
        "dw1":   p["dw1"].astype(bf16),
        "db1":   p["db1"].astype(f32),
        "dw2c":  dw2c.astype(f32),
        "db2c":  db2c.astype(f32),
    }


def fusion_midf(g, l, prepared):
    args = (g, l,
            prepared["wf_sa"], prepared["bf_sa"],
            prepared["w1_sa"], prepared["b1_sa"],
            prepared["w2_sa"], prepared["b2_sa"],
            prepared["ln_sa_g"], prepared["ln_sa_b"],
            prepared["wf_sga"], prepared["bf_sga"],
            prepared["w1_sga"], prepared["b1_sga"],
            prepared["w2_sga"], prepared["b2_sga"],
            prepared["ln_sga_g"], prepared["ln_sga_b"],
            prepared["dw1"], prepared["db1"],
            prepared["dw2c"], prepared["db2c"])
    in_specs = ([pl.BlockSpec(memory_space=pltpu.MemorySpace.VMEM)] * (len(args) - 1)
                + [pl.BlockSpec(memory_space=pltpu.MemorySpace.SMEM)])   # db2c scalar in SMEM
    return pl.pallas_call(
        fusion_midf_kernel,
        out_shape=jax.ShapeDtypeStruct((g.shape[0], g.shape[1]), jnp.float32),
        in_specs=in_specs,
        out_specs=pl.BlockSpec(memory_space=pltpu.MemorySpace.VMEM),
    )(*args)


# --------------------------- pure-JAX reference -------------------------------
# Faithful f32 spec of the PyTorch module (two-matmul MHAtt, full 2-way softmax).
def fusion_midf_ref(g, l, p):
    def mh(i, x):
        return (x @ p["wv"][i] + p["bv"][i]) @ p["wm"][i] + p["bm"][i]

    def ffn(i, x):
        return jnp.maximum(x @ p["w1"][i] + p["b1"][i], 0.0) @ p["w2"][i] + p["b2"][i]

    def ln(i, x):
        u = jnp.mean(x, -1, keepdims=True)
        s = jnp.mean((x - u) ** 2, -1, keepdims=True)
        return p["lng"][i] * ((x - u) / jnp.sqrt(s + LN_EPS)) + p["lnb"][i]

    def sa(x, im, i_f, iln):
        x = ln(iln, x + mh(im, x))
        return ln(iln + 1, x + ffn(i_f, x))

    def sga(x, y, im1, im2, i_f, iln):
        x = ln(iln, x + mh(im1, x))
        x = ln(iln + 1, x + mh(im2, y))
        return ln(iln + 2, x + ffn(i_f, x))

    g = sa(g, 0, 0, 0)
    l = sa(l, 1, 1, 2)
    l = sga(l, g, 2, 3, 2, 4)
    g = sga(g, l, 4, 5, 3, 7)
    g2 = jax.nn.sigmoid(l) * g
    l2 = g + l
    fgl = g2 + l2
    h = jax.nn.sigmoid(fgl @ p["dw1"] + p["db1"])
    dw = jax.nn.softmax(h @ p["dw2"] + p["db2"], axis=-1)
    w0 = dw[:, 0:1]                 # PyTorch code uses column 0 for both weights
    return w0 * g2 + w0 * l2


# ------------------------------ parameter init --------------------------------
def init_params(key):
    ks = jax.random.split(key, 12)
    s = 0.02
    return {
        "wv":  jax.random.normal(ks[0], (6, D, D),  jnp.float32) * s,
        "bv":  jax.random.normal(ks[1], (6, D),     jnp.float32) * s,
        "wm":  jax.random.normal(ks[2], (6, D, D),  jnp.float32) * s,
        "bm":  jax.random.normal(ks[3], (6, D),     jnp.float32) * s,
        "w1":  jax.random.normal(ks[4], (4, D, FF), jnp.float32) * s,
        "b1":  jax.random.normal(ks[5], (4, FF),    jnp.float32) * s,
        "w2":  jax.random.normal(ks[6], (4, FF, D), jnp.float32) * s,
        "b2":  jax.random.normal(ks[7], (4, D),     jnp.float32) * s,
        "lng": jnp.ones((10, D), jnp.float32),
        "lnb": jnp.zeros((10, D), jnp.float32),
        "dw1": jax.random.normal(ks[8],  (D, D_DYN), jnp.float32) * s,
        "db1": jax.random.normal(ks[9],  (1, D_DYN), jnp.float32) * s,
        "dw2": jax.random.normal(ks[10], (D_DYN, 2), jnp.float32) * s,
        "db2": jax.random.normal(ks[11], (1, 2),     jnp.float32) * s,
    }


if __name__ == "__main__":
    key = jax.random.PRNGKey(0)
    kg, kl, kp = jax.random.split(key, 3)
    global_feature = jax.random.normal(kg, (B, D), jnp.float32)
    local_feature  = jax.random.normal(kl, (B, D), jnp.float32)
    params = init_params(kp)
    prepared = prepare_params(params)

    out = fusion_midf(global_feature, local_feature, prepared)
    out = jax.block_until_ready(out)

    ref = fusion_midf_ref(global_feature, local_feature, params)
    assert out.shape == (B, D)
    # bf16 MXU operands (f32 accumulation) introduce small drift vs the pure-f32 spec.
    assert jnp.allclose(out, ref, atol=2e-2, rtol=2e-2), (
        "mismatch vs JAX reference, max abs diff = %f" % float(jnp.max(jnp.abs(out - ref))))

    print("KERNEL_OK")
</pallas_src>

<mosaic_0001>
module attributes {stable_mosaic.version = 11 : i64} {
  func.func @fusion_midf_kernel(%arg0: memref<8x128xf32, #tpu.memory_space<vmem>>, %arg1: memref<8x128xf32, #tpu.memory_space<vmem>>, %arg2: memref<2x128x128xbf16, #tpu.memory_space<vmem>>, %arg3: memref<2x1x128xf32, #tpu.memory_space<vmem>>, %arg4: memref<2x128x256xbf16, #tpu.memory_space<vmem>>, %arg5: memref<2x1x256xf32, #tpu.memory_space<vmem>>, %arg6: memref<2x256x128xbf16, #tpu.memory_space<vmem>>, %arg7: memref<2x1x128xf32, #tpu.memory_space<vmem>>, %arg8: memref<2x2x1x128xf32, #tpu.memory_space<vmem>>, %arg9: memref<2x2x1x128xf32, #tpu.memory_space<vmem>>, %arg10: memref<2x2x128x128xbf16, #tpu.memory_space<vmem>>, %arg11: memref<2x2x1x128xf32, #tpu.memory_space<vmem>>, %arg12: memref<2x128x256xbf16, #tpu.memory_space<vmem>>, %arg13: memref<2x1x256xf32, #tpu.memory_space<vmem>>, %arg14: memref<2x256x128xbf16, #tpu.memory_space<vmem>>, %arg15: memref<2x1x128xf32, #tpu.memory_space<vmem>>, %arg16: memref<2x3x1x128xf32, #tpu.memory_space<vmem>>, %arg17: memref<2x3x1x128xf32, #tpu.memory_space<vmem>>, %arg18: memref<128x64xbf16, #tpu.memory_space<vmem>>, %arg19: memref<1x64xf32, #tpu.memory_space<vmem>>, %arg20: memref<1x64xf32, #tpu.memory_space<vmem>>, %arg21: memref<1x1xf32, #tpu.memory_space<smem>>, %arg22: memref<8x128xf32, #tpu.memory_space<vmem>>) attributes {dimension_semantics = [], scalar_prefetch = 0 : i64, scratch_operands = 0 : i64, tpu.core_type = #tpu.core_type<tc>} {
    %c0 = arith.constant 0 : index
    %c0_0 = arith.constant 0 : index
    %0 = vector.load %arg0[%c0, %c0_0] : memref<8x128xf32, #tpu.memory_space<vmem>>, vector<8x128xf32>
    %c0_1 = arith.constant 0 : index
    %c0_2 = arith.constant 0 : index
    %1 = vector.load %arg1[%c0_1, %c0_2] : memref<8x128xf32, #tpu.memory_space<vmem>>, vector<8x128xf32>
    %2 = vector.shape_cast %0 : vector<8x128xf32> to vector<1x8x128xf32>
    %3 = vector.shape_cast %1 : vector<8x128xf32> to vector<1x8x128xf32>
    %4 = tpu.concatenate %2, %3 in 0 : vector<1x8x128xf32>, vector<1x8x128xf32> -> vector<2x8x128xf32>
    %c0_3 = arith.constant 0 : index
    %c0_4 = arith.constant 0 : index
    %c0_5 = arith.constant 0 : index
    %5 = vector.load %arg2[%c0_3, %c0_4, %c0_5] : memref<2x128x128xbf16, #tpu.memory_space<vmem>>, vector<2x128x128xbf16>
    %6 = arith.truncf %4 : vector<2x8x128xf32> to vector<2x8x128xbf16>
    %cst = arith.constant dense<0.000000e+00> : vector<2x8x128xf32>
    %7 = tpu.matmul %6, %5, %cst {dimension_numbers = #tpu.dot_dimension_numbers<[2], [1], [1], [2], [0, 0, 0, 1, 1, 2], [0], [0]>} : vector<2x8x128xbf16>, vector<2x128x128xbf16>, vector<2x8x128xf32> -> vector<2x8x128xf32>
    %c0_6 = arith.constant 0 : index
    %c0_7 = arith.constant 0 : index
    %c0_8 = arith.constant 0 : index
    %8 = vector.load %arg3[%c0_6, %c0_7, %c0_8] : memref<2x1x128xf32, #tpu.memory_space<vmem>>, vector<2x1x128xf32>
    %9 = vector.broadcast %8 : vector<2x1x128xf32> to vector<2x8x128xf32>
    %10 = arith.addf %7, %9 : vector<2x8x128xf32>
    %11 = arith.addf %4, %10 : vector<2x8x128xf32>
    %c0_9 = arith.constant 0 : index
    %c0_10 = arith.constant 0 : index
    %c0_11 = arith.constant 0 : index
    %c0_12 = arith.constant 0 : index
    %12 = vector.load %arg8[%c0_9, %c0_10, %c0_11, %c0_12] : memref<2x2x1x128xf32, #tpu.memory_space<vmem>>, vector<1x2x1x128xf32>
    %13 = vector.shape_cast %12 : vector<1x2x1x128xf32> to vector<2x1x128xf32>
    %c0_13 = arith.constant 0 : index
    %c0_14 = arith.constant 0 : index
    %c0_15 = arith.constant 0 : index
    %c0_16 = arith.constant 0 : index
    %14 = vector.load %arg9[%c0_13, %c0_14, %c0_15, %c0_16] : memref<2x2x1x128xf32, #tpu.memory_space<vmem>>, vector<1x2x1x128xf32>
    %15 = vector.shape_cast %14 : vector<1x2x1x128xf32> to vector<2x1x128xf32>
    %cst_17 = arith.constant dense<0.000000e+00> : vector<2x8xf32>
    %16 = vector.multi_reduction <add>, %11, %cst_17 [2] : vector<2x8x128xf32> to vector<2x8xf32>
    %17 = vector.shape_cast %16 : vector<2x8xf32> to vector<2x8x1xf32>
    %18 = arith.mulf %11, %11 : vector<2x8x128xf32>
    %cst_18 = arith.constant dense<0.000000e+00> : vector<2x8xf32>
    %19 = vector.multi_reduction <add>, %18, %cst_18 [2] : vector<2x8x128xf32> to vector<2x8xf32>
    %20 = vector.shape_cast %19 : vector<2x8xf32> to vector<2x8x1xf32>
    %cst_19 = arith.constant 7.812500e-03 : f32
    %21 = vector.broadcast %cst_19 : f32 to vector<2x8x1xf32>
    %22 = arith.mulf %17, %21 : vector<2x8x1xf32>
    %cst_20 = arith.constant 7.812500e-03 : f32
    %23 = vector.broadcast %cst_20 : f32 to vector<2x8x1xf32>
    %24 = arith.mulf %20, %23 : vector<2x8x1xf32>
    %25 = arith.mulf %22, %22 : vector<2x8x1xf32>
    %26 = arith.subf %24, %25 : vector<2x8x1xf32>
    %27 = vector.broadcast %22 : vector<2x8x1xf32> to vector<2x8x128xf32>
    %28 = arith.subf %11, %27 : vector<2x8x128xf32>
    %cst_21 = arith.constant 9.99999997E-7 : f32
    %29 = vector.broadcast %cst_21 : f32 to vector<2x8x1xf32>
    %30 = arith.addf %26, %29 : vector<2x8x1xf32>
    %31 = math.rsqrt %30 : vector<2x8x1xf32>
    %32 = vector.broadcast %31 : vector<2x8x1xf32> to vector<2x8x128xf32>
    %33 = arith.mulf %28, %32 : vector<2x8x128xf32>
    %34 = vector.broadcast %13 : vector<2x1x128xf32> to vector<2x8x128xf32>
    %35 = arith.mulf %34, %33 : vector<2x8x128xf32>
    %36 = vector.broadcast %15 : vector<2x1x128xf32> to vector<2x8x128xf32>
    %37 = arith.addf %35, %36 : vector<2x8x128xf32>
    %c0_22 = arith.constant 0 : index
    %c0_23 = arith.constant 0 : index
    %c0_24 = arith.constant 0 : index
    %38 = vector.load %arg4[%c0_22, %c0_23, %c0_24] : memref<2x128x256xbf16, #tpu.memory_space<vmem>>, vector<2x128x256xbf16>
    %39 = arith.truncf %37 : vector<2x8x128xf32> to vector<2x8x128xbf16>
    %cst_25 = arith.constant dense<0.000000e+00> : vector<2x8x256xf32>
    %40 = tpu.matmul %39, %38, %cst_25 {dimension_numbers = #tpu.dot_dimension_numbers<[2], [1], [1], [2], [0, 0, 0, 1, 1, 2], [0], [0]>} : vector<2x8x128xbf16>, vector<2x128x256xbf16>, vector<2x8x256xf32> -> vector<2x8x256xf32>
    %c0_26 = arith.constant 0 : index
    %c0_27 = arith.constant 0 : index
    %c0_28 = arith.constant 0 : index
    %41 = vector.load %arg5[%c0_26, %c0_27, %c0_28] : memref<2x1x256xf32, #tpu.memory_space<vmem>>, vector<2x1x256xf32>
    %42 = vector.broadcast %41 : vector<2x1x256xf32> to vector<2x8x256xf32>
    %43 = arith.addf %40, %42 : vector<2x8x256xf32>
    %cst_29 = arith.constant 0.000000e+00 : f32
    %44 = vector.broadcast %cst_29 : f32 to vector<2x8x256xf32>
    %45 = arith.maximumf %43, %44 : vector<2x8x256xf32>
    %c0_30 = arith.constant 0 : index
    %c0_31 = arith.constant 0 : index
    %c0_32 = arith.constant 0 : index
    %46 = vector.load %arg6[%c0_30, %c0_31, %c0_32] : memref<2x256x128xbf16, #tpu.memory_space<vmem>>, vector<2x256x128xbf16>
    %47 = arith.truncf %45 : vector<2x8x256xf32> to vector<2x8x256xbf16>
    %cst_33 = arith.constant dense<0.000000e+00> : vector<2x8x128xf32>
    %48 = tpu.matmul %47, %46, %cst_33 {dimension_numbers = #tpu.dot_dimension_numbers<[2], [1], [1], [2], [0, 0, 0, 1, 1, 2], [0], [0]>} : vector<2x8x256xbf16>, vector<2x256x128xbf16>, vector<2x8x128xf32> -> vector<2x8x128xf32>
    %c0_34 = arith.constant 0 : index
    %c0_35 = arith.constant 0 : index
    %c0_36 = arith.constant 0 : index
    %49 = vector.load %arg7[%c0_34, %c0_35, %c0_36] : memref<2x1x128xf32, #tpu.memory_space<vmem>>, vector<2x1x128xf32>
    %50 = vector.broadcast %49 : vector<2x1x128xf32> to vector<2x8x128xf32>
    %51 = arith.addf %48, %50 : vector<2x8x128xf32>
    %52 = arith.addf %37, %51 : vector<2x8x128xf32>
    %c1 = arith.constant 1 : index
    %c0_37 = arith.constant 0 : index
    %c0_38 = arith.constant 0 : index
    %c0_39 = arith.constant 0 : index
    %53 = vector.load %arg8[%c1, %c0_37, %c0_38, %c0_39] : memref<2x2x1x128xf32, #tpu.memory_space<vmem>>, vector<1x2x1x128xf32>
    %54 = vector.shape_cast %53 : vector<1x2x1x128xf32> to vector<2x1x128xf32>
    %c1_40 = arith.constant 1 : index
    %c0_41 = arith.constant 0 : index
    %c0_42 = arith.constant 0 : index
    %c0_43 = arith.constant 0 : index
    %55 = vector.load %arg9[%c1_40, %c0_41, %c0_42, %c0_43] : memref<2x2x1x128xf32, #tpu.memory_space<vmem>>, vector<1x2x1x128xf32>
    %56 = vector.shape_cast %55 : vector<1x2x1x128xf32> to vector<2x1x128xf32>
    %cst_44 = arith.constant dense<0.000000e+00> : vector<2x8xf32>
    %57 = vector.multi_reduction <add>, %52, %cst_44 [2] : vector<2x8x128xf32> to vector<2x8xf32>
    %58 = vector.shape_cast %57 : vector<2x8xf32> to vector<2x8x1xf32>
    %59 = arith.mulf %52, %52 : vector<2x8x128xf32>
    %cst_45 = arith.constant dense<0.000000e+00> : vector<2x8xf32>
    %60 = vector.multi_reduction <add>, %59, %cst_45 [2] : vector<2x8x128xf32> to vector<2x8xf32>
    %61 = vector.shape_cast %60 : vector<2x8xf32> to vector<2x8x1xf32>
    %cst_46 = arith.constant 7.812500e-03 : f32
    %62 = vector.broadcast %cst_46 : f32 to vector<2x8x1xf32>
    %63 = arith.mulf %58, %62 : vector<2x8x1xf32>
    %cst_47 = arith.constant 7.812500e-03 : f32
    %64 = vector.broadcast %cst_47 : f32 to vector<2x8x1xf32>
    %65 = arith.mulf %61, %64 : vector<2x8x1xf32>
    %66 = arith.mulf %63, %63 : vector<2x8x1xf32>
    %67 = arith.subf %65, %66 : vector<2x8x1xf32>
    %68 = vector.broadcast %63 : vector<2x8x1xf32> to vector<2x8x128xf32>
    %69 = arith.subf %52, %68 : vector<2x8x128xf32>
    %cst_48 = arith.constant 9.99999997E-7 : f32
    %70 = vector.broadcast %cst_48 : f32 to vector<2x8x1xf32>
    %71 = arith.addf %67, %70 : vector<2x8x1xf32>
    %72 = math.rsqrt %71 : vector<2x8x1xf32>
    %73 = vector.broadcast %72 : vector<2x8x1xf32> to vector<2x8x128xf32>
    %74 = arith.mulf %69, %73 : vector<2x8x128xf32>
    %75 = vector.broadcast %54 : vector<2x1x128xf32> to vector<2x8x128xf32>
    %76 = arith.mulf %75, %74 : vector<2x8x128xf32>
    %77 = vector.broadcast %56 : vector<2x1x128xf32> to vector<2x8x128xf32>
    %78 = arith.addf %76, %77 : vector<2x8x128xf32>
    %79 = vector.extract_strided_slice %78 {offsets = [0, 0, 0], sizes = [1, 8, 128], strides = [1, 1, 1]} : vector<2x8x128xf32> to vector<1x8x128xf32>
    %80 = vector.shape_cast %79 : vector<1x8x128xf32> to vector<8x128xf32>
    %81 = vector.extract_strided_slice %78 {offsets = [1, 0, 0], sizes = [1, 8, 128], strides = [1, 1, 1]} : vector<2x8x128xf32> to vector<1x8x128xf32>
    %82 = vector.shape_cast %81 : vector<1x8x128xf32> to vector<8x128xf32>
    %83 = vector.shape_cast %82 : vector<8x128xf32> to vector<1x8x128xf32>
    %84 = vector.shape_cast %80 : vector<8x128xf32> to vector<1x8x128xf32>
    %85 = tpu.concatenate %83, %84 in 0 : vector<1x8x128xf32>, vector<1x8x128xf32> -> vector<2x8x128xf32>
    %c0_49 = arith.constant 0 : index
    %c0_50 = arith.constant 0 : index
    %c0_51 = arith.constant 0 : index
    %c0_52 = arith.constant 0 : index
    %86 = vector.load %arg10[%c0_49, %c0_50, %c0_51, %c0_52] : memref<2x2x128x128xbf16, #tpu.memory_space<vmem>>, vector<1x2x128x128xbf16>
    %87 = vector.shape_cast %86 : vector<1x2x128x128xbf16> to vector<2x128x128xbf16>
    %88 = arith.truncf %85 : vector<2x8x128xf32> to vector<2x8x128xbf16>
    %cst_53 = arith.constant dense<0.000000e+00> : vector<2x8x128xf32>
    %89 = tpu.matmul %88, %87, %cst_53 {dimension_numbers = #tpu.dot_dimension_numbers<[2], [1], [1], [2], [0, 0, 0, 1, 1, 2], [0], [0]>} : vector<2x8x128xbf16>, vector<2x128x128xbf16>, vector<2x8x128xf32> -> vector<2x8x128xf32>
    %c0_54 = arith.constant 0 : index
    %c0_55 = arith.constant 0 : index
    %c0_56 = arith.constant 0 : index
    %c0_57 = arith.constant 0 : index
    %90 = vector.load %arg11[%c0_54, %c0_55, %c0_56, %c0_57] : memref<2x2x1x128xf32, #tpu.memory_space<vmem>>, vector<1x2x1x128xf32>
    %91 = vector.shape_cast %90 : vector<1x2x1x128xf32> to vector<2x1x128xf32>
    %92 = vector.broadcast %91 : vector<2x1x128xf32> to vector<2x8x128xf32>
    %93 = arith.addf %89, %92 : vector<2x8x128xf32>
    %94 = vector.extract_strided_slice %93 {offsets = [0, 0, 0], sizes = [1, 8, 128], strides = [1, 1, 1]} : vector<2x8x128xf32> to vector<1x8x128xf32>
    %95 = vector.shape_cast %94 : vector<1x8x128xf32> to vector<8x128xf32>
    %96 = arith.addf %82, %95 : vector<8x128xf32>
    %c0_58 = arith.constant 0 : index
    %c0_59 = arith.constant 0 : index
    %c0_60 = arith.constant 0 : index
    %c0_61 = arith.constant 0 : index
    %97 = vector.load %arg16[%c0_58, %c0_59, %c0_60, %c0_61] : memref<2x3x1x128xf32, #tpu.memory_space<vmem>>, vector<1x1x1x128xf32>
    %98 = vector.shape_cast %97 : vector<1x1x1x128xf32> to vector<1x128xf32>
    %c0_62 = arith.constant 0 : index
    %c0_63 = arith.constant 0 : index
    %c0_64 = arith.constant 0 : index
    %c0_65 = arith.constant 0 : index
    %99 = vector.load %arg17[%c0_62, %c0_63, %c0_64, %c0_65] : memref<2x3x1x128xf32, #tpu.memory_space<vmem>>, vector<1x1x1x128xf32>
    %100 = vector.shape_cast %99 : vector<1x1x1x128xf32> to vector<1x128xf32>
    %cst_66 = arith.constant dense<0.000000e+00> : vector<8xf32>
    %101 = vector.multi_reduction <add>, %96, %cst_66 [1] : vector<8x128xf32> to vector<8xf32>
    %102 = vector.shape_cast %101 : vector<8xf32> to vector<8x1xf32>
    %103 = arith.mulf %96, %96 : vector<8x128xf32>
    %cst_67 = arith.constant dense<0.000000e+00> : vector<8xf32>
    %104 = vector.multi_reduction <add>, %103, %cst_67 [1] : vector<8x128xf32> to vector<8xf32>
    %105 = vector.shape_cast %104 : vector<8xf32> to vector<8x1xf32>
    %cst_68 = arith.constant 7.812500e-03 : f32
    %106 = vector.broadcast %cst_68 : f32 to vector<8x1xf32>
    %107 = arith.mulf %102, %106 : vector<8x1xf32>
    %cst_69 = arith.constant 7.812500e-03 : f32
    %108 = vector.broadcast %cst_69 : f32 to vector<8x1xf32>
    %109 = arith.mulf %105, %108 : vector<8x1xf32>
    %110 = arith.mulf %107, %107 : vector<8x1xf32>
    %111 = arith.subf %109, %110 : vector<8x1xf32>
    %112 = vector.broadcast %107 : vector<8x1xf32> to vector<8x128xf32>
    %113 = arith.subf %96, %112 : vector<8x128xf32>
    %cst_70 = arith.constant 9.99999997E-7 : f32
    %114 = vector.broadcast %cst_70 : f32 to vector<8x1xf32>
    %115 = arith.addf %111, %114 : vector<8x1xf32>
    %116 = math.rsqrt %115 : vector<8x1xf32>
    %117 = vector.broadcast %116 : vector<8x1xf32> to vector<8x128xf32>
    %118 = arith.mulf %113, %117 : vector<8x128xf32>
    %119 = vector.broadcast %98 : vector<1x128xf32> to vector<8x128xf32>
    %120 = arith.mulf %119, %118 : vector<8x128xf32>
    %121 = vector.broadcast %100 : vector<1x128xf32> to vector<8x128xf32>
    %122 = arith.addf %120, %121 : vector<8x128xf32>
    %123 = vector.extract_strided_slice %93 {offsets = [1, 0, 0], sizes = [1, 8, 128], strides = [1, 1, 1]} : vector<2x8x128xf32> to vector<1x8x128xf32>
    %124 = vector.shape_cast %123 : vector<1x8x128xf32> to vector<8x128xf32>
    %125 = arith.addf %122, %124 : vector<8x128xf32>
    %c0_71 = arith.constant 0 : index
    %c1_72 = arith.constant 1 : index
    %c0_73 = arith.constant 0 : index
    %c0_74 = arith.constant 0 : index
    %126 = vector.load %arg16[%c0_71, %c1_72, %c0_73, %c0_74] : memref<2x3x1x128xf32, #tpu.memory_space<vmem>>, vector<1x1x1x128xf32>
    %127 = vector.shape_cast %126 : vector<1x1x1x128xf32> to vector<1x128xf32>
    %c0_75 = arith.constant 0 : index
    %c1_76 = arith.constant 1 : index
    %c0_77 = arith.constant 0 : index
    %c0_78 = arith.constant 0 : index
    %128 = vector.load %arg17[%c0_75, %c1_76, %c0_77, %c0_78] : memref<2x3x1x128xf32, #tpu.memory_space<vmem>>, vector<1x1x1x128xf32>
    %129 = vector.shape_cast %128 : vector<1x1x1x128xf32> to vector<1x128xf32>
    %cst_79 = arith.constant dense<0.000000e+00> : vector<8xf32>
    %130 = vector.multi_reduction <add>, %125, %cst_79 [1] : vector<8x128xf32> to vector<8xf32>
    %131 = vector.shape_cast %130 : vector<8xf32> to vector<8x1xf32>
    %132 = arith.mulf %125, %125 : vector<8x128xf32>
    %cst_80 = arith.constant dense<0.000000e+00> : vector<8xf32>
    %133 = vector.multi_reduction <add>, %132, %cst_80 [1] : vector<8x128xf32> to vector<8xf32>
    %134 = vector.shape_cast %133 : vector<8xf32> to vector<8x1xf32>
    %cst_81 = arith.constant 7.812500e-03 : f32
    %135 = vector.broadcast %cst_81 : f32 to vector<8x1xf32>
    %136 = arith.mulf %131, %135 : vector<8x1xf32>
    %cst_82 = arith.constant 7.812500e-03 : f32
    %137 = vector.broadcast %cst_82 : f32 to vector<8x1xf32>
    %138 = arith.mulf %134, %137 : vector<8x1xf32>
    %139 = arith.mulf %136, %136 : vector<8x1xf32>
    %140 = arith.subf %138, %139 : vector<8x1xf32>
    %141 = vector.broadcast %136 : vector<8x1xf32> to vector<8x128xf32>
    %142 = arith.subf %125, %141 : vector<8x128xf32>
    %cst_83 = arith.constant 9.99999997E-7 : f32
    %143 = vector.broadcast %cst_83 : f32 to vector<8x1xf32>
    %144 = arith.addf %140, %143 : vector<8x1xf32>
    %145 = math.rsqrt %144 : vector<8x1xf32>
    %146 = vector.broadcast %145 : vector<8x1xf32> to vector<8x128xf32>
    %147 = arith.mulf %142, %146 : vector<8x128xf32>
    %148 = vector.broadcast %127 : vector<1x128xf32> to vector<8x128xf32>
    %149 = arith.mulf %148, %147 : vector<8x128xf32>
    %150 = vector.broadcast %129 : vector<1x128xf32> to vector<8x128xf32>
    %151 = arith.addf %149, %150 : vector<8x128xf32>
    %c0_84 = arith.constant 0 : index
    %c0_85 = arith.constant 0 : index
    %c0_86 = arith.constant 0 : index
    %152 = vector.load %arg12[%c0_84, %c0_85, %c0_86] : memref<2x128x256xbf16, #tpu.memory_space<vmem>>, vector<1x128x256xbf16>
    %153 = vector.shape_cast %152 : vector<1x128x256xbf16> to vector<128x256xbf16>
    %154 = arith.truncf %151 : vector<8x128xf32> to vector<8x128xbf16>
    %cst_87 = arith.constant dense<0.000000e+00> : vector<8x256xf32>
    %155 = tpu.matmul %154, %153, %cst_87 {dimension_numbers = #tpu.dot_dimension_numbers<[1], [0], [0], [1], [0, 0, 1, 1], [], []>} : vector<8x128xbf16>, vector<128x256xbf16>, vector<8x256xf32> -> vector<8x256xf32>
    %c0_88 = arith.constant 0 : index
    %c0_89 = arith.constant 0 : index
    %c0_90 = arith.constant 0 : index
    %156 = vector.load %arg13[%c0_88, %c0_89, %c0_90] : memref<2x1x256xf32, #tpu.memory_space<vmem>>, vector<1x1x256xf32>
    %157 = vector.shape_cast %156 : vector<1x1x256xf32> to vector<1x256xf32>
    %158 = vector.broadcast %157 : vector<1x256xf32> to vector<8x256xf32>
    %159 = arith.addf %155, %158 : vector<8x256xf32>
    %cst_91 = arith.constant 0.000000e+00 : f32
    %160 = vector.broadcast %cst_91 : f32 to vector<8x256xf32>
    %161 = arith.maximumf %159, %160 : vector<8x256xf32>
    %c0_92 = arith.constant 0 : index
    %c0_93 = arith.constant 0 : index
    %c0_94 = arith.constant 0 : index
    %162 = vector.load %arg14[%c0_92, %c0_93, %c0_94] : memref<2x256x128xbf16, #tpu.memory_space<vmem>>, vector<1x256x128xbf16>
    %163 = vector.shape_cast %162 : vector<1x256x128xbf16> to vector<256x128xbf16>
    %164 = arith.truncf %161 : vector<8x256xf32> to vector<8x256xbf16>
    %cst_95 = arith.constant dense<0.000000e+00> : vector<8x128xf32>
    %165 = tpu.matmul %164, %163, %cst_95 {dimension_numbers = #tpu.dot_dimension_numbers<[1], [0], [0], [1], [0, 0, 1, 1], [], []>} : vector<8x256xbf16>, vector<256x128xbf16>, vector<8x128xf32> -> vector<8x128xf32>
    %c0_96 = arith.constant 0 : index
    %c0_97 = arith.constant 0 : index
    %c0_98 = arith.constant 0 : index
    %166 = vector.load %arg15[%c0_96, %c0_97, %c0_98] : memref<2x1x128xf32, #tpu.memory_space<vmem>>, vector<1x1x128xf32>
    %167 = vector.shape_cast %166 : vector<1x1x128xf32> to vector<1x128xf32>
    %168 = vector.broadcast %167 : vector<1x128xf32> to vector<8x128xf32>
    %169 = arith.addf %165, %168 : vector<8x128xf32>
    %170 = arith.addf %151, %169 : vector<8x128xf32>
    %c0_99 = arith.constant 0 : index
    %c2 = arith.constant 2 : index
    %c0_100 = arith.constant 0 : index
    %c0_101 = arith.constant 0 : index
    %171 = vector.load %arg16[%c0_99, %c2, %c0_100, %c0_101] : memref<2x3x1x128xf32, #tpu.memory_space<vmem>>, vector<1x1x1x128xf32>
    %172 = vector.shape_cast %171 : vector<1x1x1x128xf32> to vector<1x128xf32>
    %c0_102 = arith.constant 0 : index
    %c2_103 = arith.constant 2 : index
    %c0_104 = arith.constant 0 : index
    %c0_105 = arith.constant 0 : index
    %173 = vector.load %arg17[%c0_102, %c2_103, %c0_104, %c0_105] : memref<2x3x1x128xf32, #tpu.memory_space<vmem>>, vector<1x1x1x128xf32>
    %174 = vector.shape_cast %173 : vector<1x1x1x128xf32> to vector<1x128xf32>
    %cst_106 = arith.constant dense<0.000000e+00> : vector<8xf32>
    %175 = vector.multi_reduction <add>, %170, %cst_106 [1] : vector<8x128xf32> to vector<8xf32>
    %176 = vector.shape_cast %175 : vector<8xf32> to vector<8x1xf32>
    %177 = arith.mulf %170, %170 : vector<8x128xf32>
    %cst_107 = arith.constant dense<0.000000e+00> : vector<8xf32>
    %178 = vector.multi_reduction <add>, %177, %cst_107 [1] : vector<8x128xf32> to vector<8xf32>
    %179 = vector.shape_cast %178 : vector<8xf32> to vector<8x1xf32>
    %cst_108 = arith.constant 7.812500e-03 : f32
    %180 = vector.broadcast %cst_108 : f32 to vector<8x1xf32>
    %181 = arith.mulf %176, %180 : vector<8x1xf32>
    %cst_109 = arith.constant 7.812500e-03 : f32
    %182 = vector.broadcast %cst_109 : f32 to vector<8x1xf32>
    %183 = arith.mulf %179, %182 : vector<8x1xf32>
    %184 = arith.mulf %181, %181 : vector<8x1xf32>
    %185 = arith.subf %183, %184 : vector<8x1xf32>
    %186 = vector.broadcast %181 : vector<8x1xf32> to vector<8x128xf32>
    %187 = arith.subf %170, %186 : vector<8x128xf32>
    %cst_110 = arith.constant 9.99999997E-7 : f32
    %188 = vector.broadcast %cst_110 : f32 to vector<8x1xf32>
    %189 = arith.addf %185, %188 : vector<8x1xf32>
    %190 = math.rsqrt %189 : vector<8x1xf32>
    %191 = vector.broadcast %190 : vector<8x1xf32> to vector<8x128xf32>
    %192 = arith.mulf %187, %191 : vector<8x128xf32>
    %193 = vector.broadcast %172 : vector<1x128xf32> to vector<8x128xf32>
    %194 = arith.mulf %193, %192 : vector<8x128xf32>
    %195 = vector.broadcast %174 : vector<1x128xf32> to vector<8x128xf32>
    %196 = arith.addf %194, %195 : vector<8x128xf32>
    %197 = vector.shape_cast %80 : vector<8x128xf32> to vector<1x8x128xf32>
    %198 = vector.shape_cast %196 : vector<8x128xf32> to vector<1x8x128xf32>
    %199 = tpu.concatenate %197, %198 in 0 : vector<1x8x128xf32>, vector<1x8x128xf32> -> vector<2x8x128xf32>
    %c1_111 = arith.constant 1 : index
    %c0_112 = arith.constant 0 : index
    %c0_113 = arith.constant 0 : index
    %c0_114 = arith.constant 0 : index
    %200 = vector.load %arg10[%c1_111, %c0_112, %c0_113, %c0_114] : memref<2x2x128x128xbf16, #tpu.memory_space<vmem>>, vector<1x2x128x128xbf16>
    %201 = vector.shape_cast %200 : vector<1x2x128x128xbf16> to vector<2x128x128xbf16>
    %202 = arith.truncf %199 : vector<2x8x128xf32> to vector<2x8x128xbf16>
    %cst_115 = arith.constant dense<0.000000e+00> : vector<2x8x128xf32>
    %203 = tpu.matmul %202, %201, %cst_115 {dimension_numbers = #tpu.dot_dimension_numbers<[2], [1], [1], [2], [0, 0, 0, 1, 1, 2], [0], [0]>} : vector<2x8x128xbf16>, vector<2x128x128xbf16>, vector<2x8x128xf32> -> vector<2x8x128xf32>
    %c1_116 = arith.constant 1 : index
    %c0_117 = arith.constant 0 : index
    %c0_118 = arith.constant 0 : index
    %c0_119 = arith.constant 0 : index
    %204 = vector.load %arg11[%c1_116, %c0_117, %c0_118, %c0_119] : memref<2x2x1x128xf32, #tpu.memory_space<vmem>>, vector<1x2x1x128xf32>
    %205 = vector.shape_cast %204 : vector<1x2x1x128xf32> to vector<2x1x128xf32>
    %206 = vector.broadcast %205 : vector<2x1x128xf32> to vector<2x8x128xf32>
    %207 = arith.addf %203, %206 : vector<2x8x128xf32>
    %208 = vector.extract_strided_slice %207 {offsets = [0, 0, 0], sizes = [1, 8, 128], strides = [1, 1, 1]} : vector<2x8x128xf32> to vector<1x8x128xf32>
    %209 = vector.shape_cast %208 : vector<1x8x128xf32> to vector<8x128xf32>
    %210 = arith.addf %80, %209 : vector<8x128xf32>
    %c1_120 = arith.constant 1 : index
    %c0_121 = arith.constant 0 : index
    %c0_122 = arith.constant 0 : index
    %c0_123 = arith.constant 0 : index
    %211 = vector.load %arg16[%c1_120, %c0_121, %c0_122, %c0_123] : memref<2x3x1x128xf32, #tpu.memory_space<vmem>>, vector<1x1x1x128xf32>
    %212 = vector.shape_cast %211 : vector<1x1x1x128xf32> to vector<1x128xf32>
    %c1_124 = arith.constant 1 : index
    %c0_125 = arith.constant 0 : index
    %c0_126 = arith.constant 0 : index
    %c0_127 = arith.constant 0 : index
    %213 = vector.load %arg17[%c1_124, %c0_125, %c0_126, %c0_127] : memref<2x3x1x128xf32, #tpu.memory_space<vmem>>, vector<1x1x1x128xf32>
    %214 = vector.shape_cast %213 : vector<1x1x1x128xf32> to vector<1x128xf32>
    %cst_128 = arith.constant dense<0.000000e+00> : vector<8xf32>
    %215 = vector.multi_reduction <add>, %210, %cst_128 [1] : vector<8x128xf32> to vector<8xf32>
    %216 = vector.shape_cast %215 : vector<8xf32> to vector<8x1xf32>
    %217 = arith.mulf %210, %210 : vector<8x128xf32>
    %cst_129 = arith.constant dense<0.000000e+00> : vector<8xf32>
    %218 = vector.multi_reduction <add>, %217, %cst_129 [1] : vector<8x128xf32> to vector<8xf32>
    %219 = vector.shape_cast %218 : vector<8xf32> to vector<8x1xf32>
    %cst_130 = arith.constant 7.812500e-03 : f32
    %220 = vector.broadcast %cst_130 : f32 to vector<8x1xf32>
    %221 = arith.mulf %216, %220 : vector<8x1xf32>
    %cst_131 = arith.constant 7.812500e-03 : f32
    %222 = vector.broadcast %cst_131 : f32 to vector<8x1xf32>
    %223 = arith.mulf %219, %222 : vector<8x1xf32>
    %224 = arith.mulf %221, %221 : vector<8x1xf32>
    %225 = arith.subf %223, %224 : vector<8x1xf32>
    %226 = vector.broadcast %221 : vector<8x1xf32> to vector<8x128xf32>
    %227 = arith.subf %210, %226 : vector<8x128xf32>
    %cst_132 = arith.constant 9.99999997E-7 : f32
    %228 = vector.broadcast %cst_132 : f32 to vector<8x1xf32>
    %229 = arith.addf %225, %228 : vector<8x1xf32>
    %230 = math.rsqrt %229 : vector<8x1xf32>
    %231 = vector.broadcast %230 : vector<8x1xf32> to vector<8x128xf32>
    %232 = arith.mulf %227, %231 : vector<8x128xf32>
    %233 = vector.broadcast %212 : vector<1x128xf32> to vector<8x128xf32>
    %234 = arith.mulf %233, %232 : vector<8x128xf32>
    %235 = vector.broadcast %214 : vector<1x128xf32> to vector<8x128xf32>
    %236 = arith.addf %234, %235 : vector<8x128xf32>
    %237 = vector.extract_strided_slice %207 {offsets = [1, 0, 0], sizes = [1, 8, 128], strides = [1, 1, 1]} : vector<2x8x128xf32> to vector<1x8x128xf32>
    %238 = vector.shape_cast %237 : vector<1x8x128xf32> to vector<8x128xf32>
    %239 = arith.addf %236, %238 : vector<8x128xf32>
    %c1_133 = arith.constant 1 : index
    %c1_134 = arith.constant 1 : index
    %c0_135 = arith.constant 0 : index
    %c0_136 = arith.constant 0 : index
    %240 = vector.load %arg16[%c1_133, %c1_134, %c0_135, %c0_136] : memref<2x3x1x128xf32, #tpu.memory_space<vmem>>, vector<1x1x1x128xf32>
    %241 = vector.shape_cast %240 : vector<1x1x1x128xf32> to vector<1x128xf32>
    %c1_137 = arith.constant 1 : index
    %c1_138 = arith.constant 1 : index
    %c0_139 = arith.constant 0 : index
    %c0_140 = arith.constant 0 : index
    %242 = vector.load %arg17[%c1_137, %c1_138, %c0_139, %c0_140] : memref<2x3x1x128xf32, #tpu.memory_space<vmem>>, vector<1x1x1x128xf32>
    %243 = vector.shape_cast %242 : vector<1x1x1x128xf32> to vector<1x128xf32>
    %cst_141 = arith.constant dense<0.000000e+00> : vector<8xf32>
    %244 = vector.multi_reduction <add>, %239, %cst_141 [1] : vector<8x128xf32> to vector<8xf32>
    %245 = vector.shape_cast %244 : vector<8xf32> to vector<8x1xf32>
    %246 = arith.mulf %239, %239 : vector<8x128xf32>
    %cst_142 = arith.constant dense<0.000000e+00> : vector<8xf32>
    %247 = vector.multi_reduction <add>, %246, %cst_142 [1] : vector<8x128xf32> to vector<8xf32>
    %248 = vector.shape_cast %247 : vector<8xf32> to vector<8x1xf32>
    %cst_143 = arith.constant 7.812500e-03 : f32
    %249 = vector.broadcast %cst_143 : f32 to vector<8x1xf32>
    %250 = arith.mulf %245, %249 : vector<8x1xf32>
    %cst_144 = arith.constant 7.812500e-03 : f32
    %251 = vector.broadcast %cst_144 : f32 to vector<8x1xf32>
    %252 = arith.mulf %248, %251 : vector<8x1xf32>
    %253 = arith.mulf %250, %250 : vector<8x1xf32>
    %254 = arith.subf %252, %253 : vector<8x1xf32>
    %255 = vector.broadcast %250 : vector<8x1xf32> to vector<8x128xf32>
    %256 = arith.subf %239, %255 : vector<8x128xf32>
    %cst_145 = arith.constant 9.99999997E-7 : f32
    %257 = vector.broadcast %cst_145 : f32 to vector<8x1xf32>
    %258 = arith.addf %254, %257 : vector<8x1xf32>
    %259 = math.rsqrt %258 : vector<8x1xf32>
    %260 = vector.broadcast %259 : vector<8x1xf32> to vector<8x128xf32>
    %261 = arith.mulf %256, %260 : vector<8x128xf32>
    %262 = vector.broadcast %241 : vector<1x128xf32> to vector<8x128xf32>
    %263 = arith.mulf %262, %261 : vector<8x128xf32>
    %264 = vector.broadcast %243 : vector<1x128xf32> to vector<8x128xf32>
    %265 = arith.addf %263, %264 : vector<8x128xf32>
    %c1_146 = arith.constant 1 : index
    %c0_147 = arith.constant 0 : index
    %c0_148 = arith.constant 0 : index
    %266 = vector.load %arg12[%c1_146, %c0_147, %c0_148] : memref<2x128x256xbf16, #tpu.memory_space<vmem>>, vector<1x128x256xbf16>
    %267 = vector.shape_cast %266 : vector<1x128x256xbf16> to vector<128x256xbf16>
    %268 = arith.truncf %265 : vector<8x128xf32> to vector<8x128xbf16>
    %cst_149 = arith.constant dense<0.000000e+00> : vector<8x256xf32>
    %269 = tpu.matmul %268, %267, %cst_149 {dimension_numbers = #tpu.dot_dimension_numbers<[1], [0], [0], [1], [0, 0, 1, 1], [], []>} : vector<8x128xbf16>, vector<128x256xbf16>, vector<8x256xf32> -> vector<8x256xf32>
    %c1_150 = arith.constant 1 : index
    %c0_151 = arith.constant 0 : index
    %c0_152 = arith.constant 0 : index
    %270 = vector.load %arg13[%c1_150, %c0_151, %c0_152] : memref<2x1x256xf32, #tpu.memory_space<vmem>>, vector<1x1x256xf32>
    %271 = vector.shape_cast %270 : vector<1x1x256xf32> to vector<1x256xf32>
    %272 = vector.broadcast %271 : vector<1x256xf32> to vector<8x256xf32>
    %273 = arith.addf %269, %272 : vector<8x256xf32>
    %cst_153 = arith.constant 0.000000e+00 : f32
    %274 = vector.broadcast %cst_153 : f32 to vector<8x256xf32>
    %275 = arith.maximumf %273, %274 : vector<8x256xf32>
    %c1_154 = arith.constant 1 : index
    %c0_155 = arith.constant 0 : index
    %c0_156 = arith.constant 0 : index
    %276 = vector.load %arg14[%c1_154, %c0_155, %c0_156] : memref<2x256x128xbf16, #tpu.memory_space<vmem>>, vector<1x256x128xbf16>
    %277 = vector.shape_cast %276 : vector<1x256x128xbf16> to vector<256x128xbf16>
    %278 = arith.truncf %275 : vector<8x256xf32> to vector<8x256xbf16>
    %cst_157 = arith.constant dense<0.000000e+00> : vector<8x128xf32>
    %279 = tpu.matmul %278, %277, %cst_157 {dimension_numbers = #tpu.dot_dimension_numbers<[1], [0], [0], [1], [0, 0, 1, 1], [], []>} : vector<8x256xbf16>, vector<256x128xbf16>, vector<8x128xf32> -> vector<8x128xf32>
    %c1_158 = arith.constant 1 : index
    %c0_159 = arith.constant 0 : index
    %c0_160 = arith.constant 0 : index
    %280 = vector.load %arg15[%c1_158, %c0_159, %c0_160] : memref<2x1x128xf32, #tpu.memory_space<vmem>>, vector<1x1x128xf32>
    %281 = vector.shape_cast %280 : vector<1x1x128xf32> to vector<1x128xf32>
    %282 = vector.broadcast %281 : vector<1x128xf32> to vector<8x128xf32>
    %283 = arith.addf %279, %282 : vector<8x128xf32>
    %284 = arith.addf %265, %283 : vector<8x128xf32>
    %c1_161 = arith.constant 1 : index
    %c2_162 = arith.constant 2 : index
    %c0_163 = arith.constant 0 : index
    %c0_164 = arith.constant 0 : index
    %285 = vector.load %arg16[%c1_161, %c2_162, %c0_163, %c0_164] : memref<2x3x1x128xf32, #tpu.memory_space<vmem>>, vector<1x1x1x128xf32>
    %286 = vector.shape_cast %285 : vector<1x1x1x128xf32> to vector<1x128xf32>
    %c1_165 = arith.constant 1 : index
    %c2_166 = arith.constant 2 : index
    %c0_167 = arith.constant 0 : index
    %c0_168 = arith.constant 0 : index
    %287 = vector.load %arg17[%c1_165, %c2_166, %c0_167, %c0_168] : memref<2x3x1x128xf32, #tpu.memory_space<vmem>>, vector<1x1x1x128xf32>
    %288 = vector.shape_cast %287 : vector<1x1x1x128xf32> to vector<1x128xf32>
    %cst_169 = arith.constant dense<0.000000e+00> : vector<8xf32>
    %289 = vector.multi_reduction <add>, %284, %cst_169 [1] : vector<8x128xf32> to vector<8xf32>
    %290 = vector.shape_cast %289 : vector<8xf32> to vector<8x1xf32>
    %291 = arith.mulf %284, %284 : vector<8x128xf32>
    %cst_170 = arith.constant dense<0.000000e+00> : vector<8xf32>
    %292 = vector.multi_reduction <add>, %291, %cst_170 [1] : vector<8x128xf32> to vector<8xf32>
    %293 = vector.shape_cast %292 : vector<8xf32> to vector<8x1xf32>
    %cst_171 = arith.constant 7.812500e-03 : f32
    %294 = vector.broadcast %cst_171 : f32 to vector<8x1xf32>
    %295 = arith.mulf %290, %294 : vector<8x1xf32>
    %cst_172 = arith.constant 7.812500e-03 : f32
    %296 = vector.broadcast %cst_172 : f32 to vector<8x1xf32>
    %297 = arith.mulf %293, %296 : vector<8x1xf32>
    %298 = arith.mulf %295, %295 : vector<8x1xf32>
    %299 = arith.subf %297, %298 : vector<8x1xf32>
    %300 = vector.broadcast %295 : vector<8x1xf32> to vector<8x128xf32>
    %301 = arith.subf %284, %300 : vector<8x128xf32>
    %cst_173 = arith.constant 9.99999997E-7 : f32
    %302 = vector.broadcast %cst_173 : f32 to vector<8x1xf32>
    %303 = arith.addf %299, %302 : vector<8x1xf32>
    %304 = math.rsqrt %303 : vector<8x1xf32>
    %305 = vector.broadcast %304 : vector<8x1xf32> to vector<8x128xf32>
    %306 = arith.mulf %301, %305 : vector<8x128xf32>
    %307 = vector.broadcast %286 : vector<1x128xf32> to vector<8x128xf32>
    %308 = arith.mulf %307, %306 : vector<8x128xf32>
    %309 = vector.broadcast %288 : vector<1x128xf32> to vector<8x128xf32>
    %310 = arith.addf %308, %309 : vector<8x128xf32>
    %311 = arith.negf %196 : vector<8x128xf32>
    %312 = math.exp %311 : vector<8x128xf32>
    %cst_174 = arith.constant 1.000000e+00 : f32
    %313 = vector.broadcast %cst_174 : f32 to vector<8x128xf32>
    %314 = arith.addf %313, %312 : vector<8x128xf32>
    %315 = arith.divf %313, %314 : vector<8x128xf32>
    %316 = arith.mulf %315, %310 : vector<8x128xf32>
    %317 = arith.addf %310, %196 : vector<8x128xf32>
    %318 = arith.addf %316, %317 : vector<8x128xf32>
    %c0_175 = arith.constant 0 : index
    %c0_176 = arith.constant 0 : index
    %319 = vector.load %arg18[%c0_175, %c0_176] : memref<128x64xbf16, #tpu.memory_space<vmem>>, vector<128x64xbf16>
    %320 = arith.truncf %318 : vector<8x128xf32> to vector<8x128xbf16>
    %cst_177 = arith.constant dense<0.000000e+00> : vector<8x64xf32>
    %321 = tpu.matmul %320, %319, %cst_177 {dimension_numbers = #tpu.dot_dimension_numbers<[1], [0], [0], [1], [0, 0, 1, 1], [], []>} : vector<8x128xbf16>, vector<128x64xbf16>, vector<8x64xf32> -> vector<8x64xf32>
    %c0_178 = arith.constant 0 : index
    %c0_179 = arith.constant 0 : index
    %322 = vector.load %arg19[%c0_178, %c0_179] : memref<1x64xf32, #tpu.memory_space<vmem>>, vector<1x64xf32>
    %323 = vector.broadcast %322 : vector<1x64xf32> to vector<8x64xf32>
    %324 = arith.addf %321, %323 : vector<8x64xf32>
    %325 = arith.negf %324 : vector<8x64xf32>
    %326 = math.exp %325 : vector<8x64xf32>
    %cst_180 = arith.constant 1.000000e+00 : f32
    %327 = vector.broadcast %cst_180 : f32 to vector<8x64xf32>
    %328 = arith.addf %327, %326 : vector<8x64xf32>
    %329 = arith.divf %327, %328 : vector<8x64xf32>
    %c0_181 = arith.constant 0 : index
    %c0_182 = arith.constant 0 : index
    %330 = vector.load %arg20[%c0_181, %c0_182] : memref<1x64xf32, #tpu.memory_space<vmem>>, vector<1x64xf32>
    %331 = vector.broadcast %330 : vector<1x64xf32> to vector<8x64xf32>
    %332 = arith.mulf %329, %331 : vector<8x64xf32>
    %cst_183 = arith.constant dense<0.000000e+00> : vector<8xf32>
    %333 = vector.multi_reduction <add>, %332, %cst_183 [1] : vector<8x64xf32> to vector<8xf32>
    %334 = vector.shape_cast %333 : vector<8xf32> to vector<8x1xf32>
    %c0_184 = arith.constant 0 : index
    %c0_185 = arith.constant 0 : index
    %335 = memref.load %arg21[%c0_184, %c0_185] : memref<1x1xf32, #tpu.memory_space<smem>>
    %336 = vector.broadcast %335 : f32 to vector<8x1xf32>
    %337 = arith.addf %334, %336 : vector<8x1xf32>
    %338 = arith.negf %337 : vector<8x1xf32>
    %339 = math.exp %338 : vector<8x1xf32>
    %cst_186 = arith.constant 1.000000e+00 : f32
    %340 = vector.broadcast %cst_186 : f32 to vector<8x1xf32>
    %341 = arith.addf %340, %339 : vector<8x1xf32>
    %342 = arith.divf %340, %341 : vector<8x1xf32>
    %343 = vector.broadcast %342 : vector<8x1xf32> to vector<8x128xf32>
    %344 = arith.mulf %343, %318 : vector<8x128xf32>
    %c0_187 = arith.constant 0 : index
    %c0_188 = arith.constant 0 : index
    %345 = vector.load %arg22[%c0_187, %c0_188] : memref<8x128xf32, #tpu.memory_space<vmem>>, vector<8x128xf32>
    tpu.vector_store %arg22[%c0_187, %c0_188], %344 {strides = array<i32>} : memref<8x128xf32, #tpu.memory_space<vmem>>, vector<8x128xf32>,
    return
  }
}

</mosaic_0001>

<bundles_post_ra>
// kernel: tpu_custom_call.1
= control target key start
LH: loop header
LB: loop body
LE: loop exit
PB: predicated region body
PF: predicated region fallthrough
CT: control target
= control target key end

     0   :  { %s3925_s0 = inlined_call_operand.vmem [shape: f32[8,128], index: 0, kind: input, shape index: {}]   ;;  %s3926_s1 = inlined_call_operand.vmem [shape: f32[8,128], index: 1, kind: input, shape index: {}]   ;;  %s3927_s2 = inlined_call_operand.hbm [shape: bf16[2,128,128], index: 2, kind: input, shape index: {}]   ;;  %s3928_s3 = inlined_call_operand.vmem [shape: f32[2,1,128], index: 3, kind: input, shape index: {}]   ;;  %s3929_s4 = inlined_call_operand.hbm [shape: bf16[2,128,256], index: 4, kind: input, shape index: {}]   ;;  %s3930_s5 = inlined_call_operand.vmem [shape: f32[2,1,256], index: 5, kind: input, shape index: {}]   ;;  %s3931_s6 = inlined_call_operand.hbm [shape: bf16[2,256,128], index: 6, kind: input, shape index: {}]   ;;  %s3932_s7 = inlined_call_operand.vmem [shape: f32[2,1,128], index: 7, kind: input, shape index: {}]   ;;  %s3933_s8 = inlined_call_operand.vmem [shape: f32[2,2,1,128], index: 8, kind: input, shape index: {}]   ;;  %s3934_s9 = inlined_call_operand.vmem [shape: f32[2,2,1,128], index: 9, kind: input, shape index: {}]   ;;  %s3935_s10 = inlined_call_operand.hbm [shape: bf16[2,2,128,128], index: 10, kind: input, shape index: {}]   ;;  %s3936_s11 = inlined_call_operand.vmem [shape: f32[2,2,1,128], index: 11, kind: input, shape index: {}]   ;;  %s3937_s12 = inlined_call_operand.hbm [shape: bf16[2,128,256], index: 12, kind: input, shape index: {}]   ;;  %s3938_s13 = inlined_call_operand.vmem [shape: f32[2,1,256], index: 13, kind: input, shape index: {}]   ;;  %s3939_s14 = inlined_call_operand.hbm [shape: bf16[2,256,128], index: 14, kind: input, shape index: {}]   ;;  %s3940_s15 = inlined_call_operand.vmem [shape: f32[2,1,128], index: 15, kind: input, shape index: {}]   ;;  %s3941_s16 = inlined_call_operand.vmem [shape: f32[2,3,1,128], index: 16, kind: input, shape index: {}]   ;;  %s3942_s17 = inlined_call_operand.vmem [shape: f32[2,3,1,128], index: 17, kind: input, shape index: {}]   ;;  %s3943_s18 = inlined_call_operand.vmem [shape: bf16[128,64], index: 18, kind: input, shape index: {}]   ;;  %s3944_s19 = inlined_call_operand.vmem [shape: f32[1,64], index: 19, kind: input, shape index: {}]   ;;  %s3945_s20 = inlined_call_operand.vmem [shape: f32[1,64], index: 20, kind: input, shape index: {}]   ;;  %s3946_s21 = inlined_call_operand.<no memory space> [shape: f32[1,1], index: 21, kind: input, shape index: {}]   ;;  %s3947_s22 = inlined_call_operand.hbm [shape: f32[8,128], index: 22, kind: output, shape index: {}]  }
   0x1   :  { %3951 = sst [smem:[#allocation20_spill]] %s3925_s0 }
   0x2   :  { %3952 = sst [smem:[#allocation21_spill]] %s3926_s1 }
   0x3   :  { %3953 = sst [smem:[#allocation22_spill]] %s3927_s2 }
   0x4   :  { %3954 = sst [smem:[#allocation23_spill]] %s3928_s3 }
   0x5   :  { %3955 = sst [smem:[#allocation24_spill]] %s3929_s4 }
   0x6   :  { %3956 = sst [smem:[#allocation25_spill]] %s3930_s5 }
   0x7   :  { %3957 = sst [smem:[#allocation26_spill]] %s3931_s6 }
   0x8   :  { %3958 = sst [smem:[#allocation27_spill]] %s3945_s20 }
   0x9   :  { %3959 = sst [smem:[#allocation28_spill]] %s3946_s21 }
   0xa   :  { %3960 = sst [smem:[#allocation29_spill]] %s3947_s22 }
   0xb   :  { %28 = vsyncpa [#allocation4], 0 }
   0xc   :  { %29 = vsyncpa [#allocation7], 0 }
   0xd   :  { %30 = vsyncpa [#allocation10], 0 }
   0xe   :  { %31 = vsyncpa [#allocation13], 0  ;;  %s3961_s29 = sld [smem:[#allocation24_spill]] }
  0x14   :  { %s56_s30 = sshll.u32 %s3961_s29, 4  ;;  %s57_s30 = int_to_ptr.hbm [resolvable:$true] %s56_s30 }
  0x15   :  { %32 = vsyncpa [#allocation5], 0  ;;  %s3554_s4 = smov [#allocation6]   ;;  %s3950_s23 = smov 128  }
  0x16   :  { %s58_s0 = sshll.u32 %s3554_s4, 4  ;;  %s3556_s1 = smov 8   ;;  %s59_s0 = int_to_ptr.vmem [resolvable:$true] %s58_s0 }
  0x17   :  { %64 = dma.hbm_to_vmem [thread:$0]  %s57_s30, 4096, %s59_s0, [#allocation7], %s3950_s23, %s3950_s23, %s3556_s1  }
  0x18   :  { %s90_s6 = sshll.u32 %s3935_s10, 4  ;;  %s3557_s25 = smov [#allocation9]   ;;  %s91_s6 = int_to_ptr.hbm [resolvable:$true] %s90_s6 }
  0x19   :  { %s92_s26 = sshll.u32 %s3557_s25, 4  ;;  %s3962_s3 = sld [smem:[#allocation22_spill]]  ;;  %s93_s26 = int_to_ptr.vmem [resolvable:$true] %s92_s26 }
  0x1a   :  { %s3558_s29 = smov 64   ;;  %s3559_s4 = smov 4  }
  0x1b   :  { %98 = dma.hbm_to_vmem [thread:$0]  %s91_s6, 4096, %s93_s26, [#allocation10], %s3558_s29, %s3558_s29, %s3559_s4  }
  0x1c   :  { %s3963_s20 = sld [smem:[#allocation26_spill]]  ;;  %s3560_s0 = smov [#allocation3]  }
  0x1d   :  { %s43_s23 = sshll.u32 %s3560_s0, 4  ;;  %s3561_s10 = smov [#allocation8]   ;;  %s44_s23 = int_to_ptr.vmem [resolvable:$true] %s43_s23 }
  0x1e   :  { %s73_s5 = sshll.u32 %s3561_s10, 4  ;;  %s105_s2 = sshll.u32 %s3937_s12, 4  ;;  %s74_s5 = int_to_ptr.vmem [resolvable:$true] %s73_s5  ;;  %s106_s2 = int_to_ptr.hbm [resolvable:$true] %s105_s2 }
  0x1f   :  { %s41_s28 = sshll.u32 %s3962_s3, 4  ;;  %s120_s26 = sshll.u32 %s3939_s14, 4  ;;  %s42_s28 = int_to_ptr.hbm [resolvable:$true] %s41_s28  ;;  %s121_s26 = int_to_ptr.hbm [resolvable:$true] %s120_s26 }
  0x20   :  { %49 = dma.hbm_to_vmem [thread:$0]  %s42_s28, 2048, %s44_s23, [#allocation4], %s3558_s29, %s3558_s29, %s3559_s4  }
  0x21   :  { %s3562_s21 = smov [#allocation11]   ;;  %s3964_s22 = smov 128  }
  0x22   :  { %s71_s30 = sshll.u32 %s3963_s20, 4  ;;  %s107_s20 = sshll.u32 %s3562_s21, 4  ;;  %s72_s30 = int_to_ptr.hbm [resolvable:$true] %s71_s30  ;;  %s108_s20 = int_to_ptr.vmem [resolvable:$true] %s107_s20 }
  0x23   :  { %79 = dma.hbm_to_vmem [thread:$0]  %s72_s30, 4096, %s74_s5, [#allocation7], %s3558_s29, %s3558_s29, %s3559_s4  }
  0x24   :  { %113 = dma.hbm_to_vmem [thread:$0]  %s106_s2, 4096, %s108_s20, [#allocation10], %s3964_s22, %s3964_s22, %s3556_s1  }
  0x25   :  { %s3563_s23 = smov [#allocation12]  }
  0x26   :  { %s122_s3 = sshll.u32 %s3563_s23, 4  ;;  %s123_s3 = int_to_ptr.vmem [resolvable:$true] %s122_s3 }
  0x27   :  { %128 = dma.hbm_to_vmem [thread:$0]  %s121_s26, 4096, %s123_s3, [#allocation13], %s3558_s29, %s3558_s29, %s3559_s4  }
  0x28   :  { %3544 = dma.done.wait [#allocation4], 2048  }
  0x29   :  { %3545 = vsyncadd [#allocation4], 4294965248 }
  0x2a   :  { %3546 = dma.done.wait [#allocation7], 8192  }
  0x2b   :  { %3547 = vsyncadd [#allocation7], 4294959104 }
  0x2c   :  { %3548 = dma.done.wait [#allocation10], 8192  }
  0x2d   :  { %3549 = vsyncadd [#allocation10], 4294959104 }
  0x2e   :  { %3550 = dma.done.wait [#allocation13], 4096  }
  0x2f   :  { %3551 = vsyncadd [#allocation13], 4294963200  ;;  %v3124_v0 = vld [vmem:[#allocation3 + $0x38] sm:$0xff]  ;;  %v3123_v2 = vld [vmem:[#allocation3 + $0x30] sm:$0xff]  ;;  %s3965_s1 = sld [smem:[#allocation20_spill]]  ;;  %s3564_s3 = smov [#allocation14]  }
  0x30   :  { %v3132_v1 = vld [vmem:[#allocation3 + $0x78] sm:$0xff]  ;;  %259 = vmatpush.bf16.msra.mxu0 %v3124_v0  ;;  %v3131_v3 = vld [vmem:[#allocation3 + $0x70] sm:$0xff]  ;;  %v3122_v4 = vld [vmem:[#allocation3 + $0x28] sm:$0xff]  ;;  %s3966_s4 = sld [smem:[#allocation21_spill]] }
  0x31   :  { %320 = vmatpush.bf16.msra.mxu1 %v3132_v1  ;;  %v3130_v5 = vld [vmem:[#allocation3 + $0x68] sm:$0xff]  ;;  %v3121_v6 = vld [vmem:[#allocation3 + $0x20] sm:$0xff]  ;;  %v3120_v8 = vld [vmem:[#allocation3 + $0x18] sm:$0xff]  ;;  %s3967_s10 = sld [smem:[#allocation23_spill]] }
  0x32   :  { %v3129_v7 = vld [vmem:[#allocation3 + $0x60] sm:$0xff]  ;;  %v3128_v9 = vld [vmem:[#allocation3 + $0x58] sm:$0xff]  ;;  %v3119_v10 = vld [vmem:[#allocation3 + $0x10] sm:$0xff]  ;;  %s3968_s12 = sld [smem:[#allocation25_spill]] }
  0x33   :  { %v3127_v11 = vld [vmem:[#allocation3 + $0x50] sm:$0xff]  ;;  %v3118_v12 = vld [vmem:[#allocation3 + $0x8] sm:$0xff]  ;;  %v3117_v14 = vld [vmem:[#allocation3] sm:$0xff]  ;;  %s3970_s23 = sld [smem:[#allocation28_spill]] }
  0x34   :  { %260 = vmatpush.bf16.msra.mxu0 %v3123_v2  ;;  %v3126_v13 = vld [vmem:[#allocation3 + $0x48] sm:$0xff]  ;;  %v3125_v15 = vld [vmem:[#allocation3 + $0x40] sm:$0xff]  ;;  %v2482_v32 = vld [vmem:[#allocation6 + $0x70] sm:$0xf] }
  0x35   :  { %321 = vmatpush.bf16.msra.mxu1 %v3131_v3  ;;  %v167_v16 = vld [vmem:[%s3965_s1] sm:$0xff]  ;;  %v3148_v33 = vld [vmem:[#allocation6 + $0x74] sm:$0xf0]  ;;  %v3147_v34 = vld [vmem:[#allocation6 + $0x74] sm:$0xf]  ;;  %s3971_s1 = sld [smem:[#allocation29_spill]] }
  0x36   :  { %v168_v17 = vld [vmem:[%s3966_s4] sm:$0xff]  ;;  %v201_v18 = vpack.c.bf16 %v167_v16, %v167_v16  ;;  %v2483_v35 = vor.u32 %v3148_v33, %v2482_v32  ;;  %v2484_v36 = vld [vmem:[#allocation6 + $0x78] sm:$0xf0]  ;;  %v2546_v37 = vld [vmem:[#allocation6 + $0xf0] sm:$0xf] }
  0x37   :  { %v202_v19 = vpack.c.bf16 %v168_v17, %v168_v17  ;;  %v3312_v20 = vld [vmem:[%s3967_s10] ss:$0 sm:$0xff]  ;;  %v3313_v21 = vld [vmem:[%s3967_s10 + $0x1] ss:$0 sm:$0xff]  ;;  %v3164_v38 = vld [vmem:[#allocation6 + $0xf4] sm:$0xf0]  ;;  %v2487_v39 = vor.u32 %v3147_v34, %v2484_v36 }
  0x38   :  { %261 = vmatpush.bf16.msra.mxu0 %v3122_v4  ;;  %v2547_v40 = vor.u32 %v3164_v38, %v2546_v37  ;;  %v3163_v41 = vld [vmem:[#allocation6 + $0xf4] sm:$0xf]  ;;  %v2548_v42 = vld [vmem:[#allocation6 + $0xf8] sm:$0xf0]  ;;  %525 = vmatpush.bf16.msra.mxu2 %v2483_v35  ;;  %v2474_v44 = vld [vmem:[#allocation6 + $0x60] sm:$0xf] }
  0x39   :  { %322 = vmatpush.bf16.msra.mxu1 %v3130_v5  ;;  %v2551_v43 = vor.u32 %v3163_v41, %v2548_v42  ;;  %538 = vmatpush.bf16.msra.mxu3 %v2487_v39  ;;  %v3146_v45 = vld [vmem:[#allocation6 + $0x64] sm:$0xf0]  ;;  %v3145_v46 = vld [vmem:[#allocation6 + $0x64] sm:$0xf]  ;;  %v2476_v48 = vld [vmem:[#allocation6 + $0x68] sm:$0xf0] }
  0x3a   :  { %v2475_v47 = vor.u32 %v3146_v45, %v2474_v44  ;;  %v2538_v49 = vld [vmem:[#allocation6 + $0xe0] sm:$0xf]  ;;  %v3162_v50 = vld [vmem:[#allocation6 + $0xe4] sm:$0xf0]  ;;  %v2479_v51 = vor.u32 %v3145_v46, %v2476_v48  ;;  %v3161_v53 = vld [vmem:[#allocation6 + $0xe4] sm:$0xf] }
  0x3b   :  { %v2539_v52 = vor.u32 %v3162_v50, %v2538_v49  ;;  %v2540_v54 = vld [vmem:[#allocation6 + $0xe8] sm:$0xf0]  ;;  %v2466_v56 = vld [vmem:[#allocation6 + $0x50] sm:$0xf]  ;;  %v3144_v57 = vld [vmem:[#allocation6 + $0x54] sm:$0xf0] }
  0x3c   :  { %262 = vmatpush.bf16.msra.mxu0 %v3121_v6  ;;  %526 = vmatpush.bf16.msra.mxu2 %v2475_v47  ;;  %v2543_v55 = vor.u32 %v3161_v53, %v2540_v54  ;;  %v3143_v58 = vld [vmem:[#allocation6 + $0x54] sm:$0xf]  ;;  %v2467_v59 = vor.u32 %v3144_v57, %v2466_v56  ;;  %v2468_v60 = vld [vmem:[#allocation6 + $0x58] sm:$0xf0]  ;;  %v2530_v61 = vld [vmem:[#allocation6 + $0xd0] sm:$0xf] }
  0x3d   :  { %323 = vmatpush.bf16.msra.mxu1 %v3129_v7  ;;  %539 = vmatpush.bf16.msra.mxu3 %v2479_v51  ;;  %v3160_v62 = vld [vmem:[#allocation6 + $0xd4] sm:$0xf0]  ;;  %v2471_v63 = vor.u32 %v3143_v58, %v2468_v60  ;;  %v3159_v1 = vld [vmem:[#allocation6 + $0xd4] sm:$0xf]  ;;  %v2532_v2 = vld [vmem:[#allocation6 + $0xd8] sm:$0xf0] }
  0x3e   :  { %v2531_v0 = vor.u32 %v3160_v62, %v2530_v61  ;;  %v2535_v3 = vor.u32 %v3159_v1, %v2532_v2  ;;  %v2458_v4 = vld [vmem:[#allocation6 + $0x40] sm:$0xf]  ;;  %v3142_v5 = vld [vmem:[#allocation6 + $0x44] sm:$0xf0]  ;;  %v3141_v6 = vld [vmem:[#allocation6 + $0x44] sm:$0xf] }
  0x3f   :  { %v2459_v7 = vor.u32 %v3142_v5, %v2458_v4  ;;  %v3137_v32 = vld [vmem:[#allocation6 + $0x24] sm:$0xf]  ;;  %v2444_v34 = vld [vmem:[#allocation6 + $0x28] sm:$0xf0]  ;;  %v2506_v35 = vld [vmem:[#allocation6 + $0xa0] sm:$0xf] }
  0x40   :  { %263 = vmatpush.bf16.msra.mxu0 %v3120_v8  ;;  %527 = vmatpush.bf16.msra.mxu2 %v2467_v59  ;;  %v2460_v8 = vld [vmem:[#allocation6 + $0x48] sm:$0xf0]  ;;  %v3154_v36 = vld [vmem:[#allocation6 + $0xa4] sm:$0xf0]  ;;  %v2447_v37 = vor.u32 %v3137_v32, %v2444_v34  ;;  %v3153_v39 = vld [vmem:[#allocation6 + $0xa4] sm:$0xf] }
  0x41   :  { %324 = vmatpush.bf16.msra.mxu1 %v3128_v9  ;;  %540 = vmatpush.bf16.msra.mxu3 %v2471_v63  ;;  %v2522_v9 = vld [vmem:[#allocation6 + $0xc0] sm:$0xf]  ;;  %v2507_v38 = vor.u32 %v3154_v36, %v2506_v35  ;;  %v2434_v44 = vld [vmem:[#allocation6 + $0x10] sm:$0xf]  ;;  %v3136_v45 = vld [vmem:[#allocation6 + $0x14] sm:$0xf0] }
  0x42   :  { %v3135_v46 = vld [vmem:[#allocation6 + $0x14] sm:$0xf]  ;;  %v2435_v48 = vor.u32 %v3136_v45, %v2434_v44  ;;  %v2436_v49 = vld [vmem:[#allocation6 + $0x18] sm:$0xf0]  ;;  %v2498_v50 = vld [vmem:[#allocation6 + $0x90] sm:$0xf] }
  0x43   :  { %v2439_v51 = vor.u32 %v3135_v46, %v2436_v49  ;;  %v3151_v53 = vld [vmem:[#allocation6 + $0x94] sm:$0xf]  ;;  %v2500_v54 = vld [vmem:[#allocation6 + $0x98] sm:$0xf0]  ;;  %v3134_v56 = vld [vmem:[#allocation6 + $0x4] sm:$0xf0] }
  0x44   :  { %264 = vmatpush.bf16.msra.mxu0 %v3119_v10  ;;  %v3158_v10 = vld [vmem:[#allocation6 + $0xc4] sm:$0xf0]  ;;  %528 = vmatpush.bf16.msra.mxu2 %v2459_v7  ;;  %v3133_v57 = vld [vmem:[#allocation6 + $0x4] sm:$0xf]  ;;  %v2503_v59 = vor.u32 %v3151_v53, %v2500_v54  ;;  %v2428_v61 = vld [vmem:[#allocation6 + $0x8] sm:$0xf0] }
  0x45   :  { %325 = vmatpush.bf16.msra.mxu1 %v3127_v11  ;;  %v2463_v11 = vor.u32 %v3141_v6, %v2460_v8  ;;  %v2490_v62 = vld [vmem:[#allocation6 + $0x80] sm:$0xf]  ;;  %v3150_v63 = vld [vmem:[#allocation6 + $0x84] sm:$0xf0]  ;;  %v2431_v1 = vor.u32 %v3133_v57, %v2428_v61  ;;  %v3149_v2 = vld [vmem:[#allocation6 + $0x84] sm:$0xf] }
  0x46   :  { %v2491_v4 = vor.u32 %v3150_v63, %v2490_v62  ;;  %v3177_v34 = vld [vmem:[#allocation8 + $0x60] sm:$0xff]  ;;  %v3183_v62 = vld [vmem:[#allocation8 + $0x90] sm:$0xff]  ;;  %s2347_s28 = sshll.u32 %s3971_s1, 4  ;;  %s2348_s28 = int_to_ptr.hbm [resolvable:$true] %s2347_s28 }
  0x47   :  { %541 = vmatpush.bf16.msra.mxu3 %v2463_v11  ;;  %v3314_v53 = vld [vmem:[%s3933_s8] ss:$0 sm:$0xff]  ;;  %v3191_v63 = vld [vmem:[#allocation8 + $0xd0] sm:$0xff] }
  0x48   :  { %265 = vmatpush.bf16.msra.mxu0 %v3118_v12  ;;  %v2523_v12 = vor.u32 %v3158_v10, %v2522_v9  ;;  %v3315_v57 = vld [vmem:[%s3934_s9] ss:$0 sm:$0xff] }
  0x49   :  { %326 = vmatpush.bf16.msra.mxu1 %v3126_v13  ;;  %v3157_v13 = vld [vmem:[#allocation6 + $0xc4] sm:$0xf] }
  0x4c   :  { %266 = vmatpush.bf16.msra.mxu0 %v3117_v14  ;;  %v2524_v14 = vld [vmem:[#allocation6 + $0xc8] sm:$0xf0] }
  0x4d   :  { %327 = vmatpush.bf16.msra.mxu1 %v3125_v15  ;;  %v2527_v15 = vor.u32 %v3157_v13, %v2524_v14  ;;  %v3196_v13 = vld [vmem:[#allocation8 + $0xf8] sm:$0xff] }
  0x4f   :  { %267 = vmatmul.bf16.vlgmr.msra.gmra.mxu0 %v201_v18  ;;  %v3139_v18 = vld [vmem:[#allocation6 + $0x34] sm:$0xf] }
  0x50   :  { %328 = vmatmul.bf16.vlgmr.msra.gmra.mxu1 %v202_v19  ;;  %631 = vmatpush.bf16.msrb.mxu0 %v2547_v40  ;;  %v2508_v40 = vld [vmem:[#allocation6 + $0xa8] sm:$0xf0] }
  0x51   :  { %644 = vmatpush.bf16.msrb.mxu1 %v2551_v43  ;;  %v2511_v41 = vor.u32 %v3153_v39, %v2508_v40  ;;  %v3184_v39 = vld [vmem:[#allocation8 + $0x98] sm:$0xff] }
  0x52   :  { %v3192_v40 = vld [vmem:[#allocation8 + $0xd8] sm:$0xff] }
  0x54   :  { %632 = vmatpush.bf16.msrb.mxu0 %v2539_v52  ;;  %v3152_v52 = vld [vmem:[#allocation6 + $0x94] sm:$0xf0] }
  0x55   :  { %645 = vmatpush.bf16.msrb.mxu1 %v2543_v55  ;;  %v2426_v55 = vld [vmem:[#allocation6] sm:$0xf]  ;;  %v2499_v58 = vor.u32 %v3152_v52, %v2498_v50 }
  0x56   :  { %v2427_v60 = vor.u32 %v3134_v56, %v2426_v55  ;;  %v3316_v50 = vld [vmem:[%s3933_s8 + $0x1] ss:$0 sm:$0xff] }
  0x58   :  { %633 = vmatpush.bf16.msrb.mxu0 %v2531_v0 }
  0x59   :  { %646 = vmatpush.bf16.msrb.mxu1 %v2535_v3  ;;  %v2492_v3 = vld [vmem:[#allocation6 + $0x88] sm:$0xf0] }
  0x5a   :  { %v2495_v5 = vor.u32 %v3149_v2, %v2492_v3  ;;  %v3182_v2 = vld [vmem:[#allocation8 + $0x88] sm:$0xff] }
  0x5b   :  { %v3190_v3 = vld [vmem:[#allocation8 + $0xc8] sm:$0xff] }
  0x5c   :  { %634 = vmatpush.bf16.msrb.mxu0 %v2523_v12  ;;  %v3188_v12 = vld [vmem:[#allocation8 + $0xb8] sm:$0xff] }
  0x5d   :  { %647 = vmatpush.bf16.msrb.mxu1 %v2527_v15 }
  0xcc   :  { %v268_v22 = vpop.f32.mrf.mxu0 }
  0xcd   :  { %v329_v23 = vpop.f32.mrf.mxu1  ;;  %v269_v24 = vadd.f32 %v3312_v20, %v268_v22  ;;  %v2452_v20 = vld [vmem:[#allocation6 + $0x38] sm:$0xf0]  ;;  %v3156_v22 = vld [vmem:[#allocation6 + $0xb4] sm:$0xf0] }
  0xce   :  { %v330_v25 = vadd.f32 %v3313_v21, %v329_v23  ;;  %v2514_v21 = vld [vmem:[#allocation6 + $0xb0] sm:$0xf]  ;;  %v2455_v23 = vor.u32 %v3139_v18, %v2452_v20 }
  0xcf   :  { %v3716_v26 = vadd.f32 %v269_v24, %v167_v16  ;;  %v2450_v16 = vld [vmem:[#allocation6 + $0x30] sm:$0xf]  ;;  %v2515_v24 = vor.u32 %v3156_v22, %v2514_v21 }
  0xd0   :  { %v3718_v27 = vadd.f32 %v330_v25, %v168_v17  ;;  %v3140_v17 = vld [vmem:[#allocation6 + $0x34] sm:$0xf0]  ;;  %v3155_v25 = vld [vmem:[#allocation6 + $0xb4] sm:$0xf]  ;;  %542 = vmatpush.bf16.msra.mxu3 %v2455_v23 }
  0xd1   :  { %339 = vadd.xlane.f32.xlu1 %v3716_v26  ;;  %v343_v30 = vmul.f32 %v3716_v26, %v3716_v26  ;;  %v2451_v19 = vor.u32 %v3140_v17, %v2450_v16  ;;  %635 = vmatpush.bf16.msrb.mxu0 %v2515_v24  ;;  %v3172_v16 = vld [vmem:[#allocation8 + $0x38] sm:$0xff]  ;;  %v3187_v18 = vld [vmem:[#allocation8 + $0xb0] sm:$0xff]  ;;  %v3186_v24 = vld [vmem:[#allocation8 + $0xa8] sm:$0xff] }
  0xd2   :  { %341 = vadd.xlane.f32.xlu0 %v3718_v27  ;;  %v344_v31 = vmul.f32 %v3718_v27, %v3718_v27  ;;  %v3180_v17 = vld [vmem:[#allocation8 + $0x78] sm:$0xff]  ;;  %v3171_v22 = vld [vmem:[#allocation8 + $0x30] sm:$0xff] }
  0xd3   :  { %529 = vmatpush.bf16.msra.mxu2 %v2451_v19  ;;  %v3195_v19 = vld [vmem:[#allocation8 + $0xf0] sm:$0xff] }
  0xd4   :  { %v270_v29 = vpop.f32.mrf.mxu0  ;;  %543 = vmatpush.bf16.msra.mxu3 %v2447_v37  ;;  %v3179_v23 = vld [vmem:[#allocation8 + $0x70] sm:$0xff] }
  0xd5   :  { %v331_v28 = vpop.f32.mrf.mxu1  ;;  %636 = vmatpush.bf16.msrb.mxu0 %v2507_v38 }
  0xd6   :  { %v2516_v28 = vld [vmem:[#allocation6 + $0xb8] sm:$0xf0] }
  0xd7   :  { %v2519_v29 = vor.u32 %v3155_v25, %v2516_v28  ;;  %v3194_v25 = vld [vmem:[#allocation8 + $0xe8] sm:$0xff] }
  0xd8   :  { %544 = vmatpush.bf16.msra.mxu3 %v2439_v51  ;;  %v3170_v28 = vld [vmem:[#allocation8 + $0x28] sm:$0xff] }
  0xd9   :  { %345 = vadd.xlane.f32.xlu1 %v343_v30  ;;  %v2442_v30 = vld [vmem:[#allocation6 + $0x20] sm:$0xf]  ;;  %648 = vmatpush.bf16.msrb.mxu1 %v2519_v29  ;;  %v3178_v29 = vld [vmem:[#allocation8 + $0x68] sm:$0xff] }
  0xda   :  { %347 = vadd.xlane.f32.xlu0 %v344_v31  ;;  %v3138_v31 = vld [vmem:[#allocation6 + $0x24] sm:$0xf0]  ;;  %637 = vmatpush.bf16.msrb.mxu0 %v2499_v58 }
  0xdb   :  { %v2443_v33 = vor.u32 %v3138_v31, %v2442_v30  ;;  %v3185_v30 = vld [vmem:[#allocation8 + $0xa0] sm:$0xff] }
  0xdc   :  { %545 = vmatpush.bf16.msra.mxu3 %v2431_v1  ;;  %v3193_v31 = vld [vmem:[#allocation8 + $0xe0] sm:$0xff]  ;;  %v3176_v1 = vld [vmem:[#allocation8 + $0x58] sm:$0xff] }
  0xdd   :  { %530 = vmatpush.bf16.msra.mxu2 %v2443_v33  ;;  %649 = vmatpush.bf16.msrb.mxu1 %v2511_v41  ;;  %v3169_v33 = vld [vmem:[#allocation8 + $0x20] sm:$0xff] }
  0xde   :  { %638 = vmatpush.bf16.msrb.mxu0 %v2491_v4  ;;  %v3167_v4 = vld [vmem:[#allocation8 + $0x10] sm:$0xff] }
  0xe0   :  { %851 = vmatpush.bf16.msrb.mxu3 %v3180_v17 }
  0xe1   :  { %531 = vmatpush.bf16.msra.mxu2 %v2435_v48  ;;  %650 = vmatpush.bf16.msrb.mxu1 %v2503_v59 }
  0xe2   :  { %967 = vmatpush.bf16.msra.mxu0 %v3188_v12  ;;  %v434_v12 = vld [vmem:[%s3968_s12 + $0x2] sm:$0x3] }
  0xe4   :  { %852 = vmatpush.bf16.msrb.mxu3 %v3179_v23 }
  0xe5   :  { %532 = vmatpush.bf16.msra.mxu2 %v2427_v60  ;;  %651 = vmatpush.bf16.msrb.mxu1 %v2495_v5  ;;  %v3175_v5 = vld [vmem:[#allocation8 + $0x50] sm:$0xff] }
  0xe6   :  { %968 = vmatpush.bf16.msra.mxu0 %v3187_v18 }
  0xe8   :  { %853 = vmatpush.bf16.msrb.mxu3 %v3178_v29 }
  0xe9   :  { %980 = vmatpush.bf16.msra.mxu1 %v3196_v13  ;;  %838 = vmatpush.bf16.msrb.mxu2 %v3172_v16  ;;  %v439_v13 = vperm.slane %v434_v12, 0 }
  0xea   :  { %969 = vmatpush.bf16.msra.mxu0 %v3186_v24 }
  0xec   :  { %854 = vmatpush.bf16.msrb.mxu3 %v3177_v34 }
  0xed   :  { %981 = vmatpush.bf16.msra.mxu1 %v3195_v19  ;;  %839 = vmatpush.bf16.msrb.mxu2 %v3171_v22  ;;  %v433_v19 = vld [vmem:[%s3968_s12] sm:$0x3]  ;;  %s2345_s12 = sshll.u32 %s3564_s3, 4  ;;  %s2346_s12 = int_to_ptr.vmem [resolvable:$true] %s2345_s12 }
  0xee   :  { %970 = vmatpush.bf16.msra.mxu0 %v3185_v30  ;;  %v437_v22 = vperm.slane %v433_v19, 0  ;;  %v438_v23 = vperm.slane %v433_v19, 1 }
  0xf0   :  { %855 = vmatpush.bf16.msrb.mxu3 %v3176_v1  ;;  %v3212_v1 = vld [vmem:[#allocation9 + $0x78] sm:$0xff] }
  0xf1   :  { %982 = vmatpush.bf16.msra.mxu1 %v3194_v25  ;;  %840 = vmatpush.bf16.msrb.mxu2 %v3170_v28 }
  0xf2   :  { %971 = vmatpush.bf16.msra.mxu0 %v3184_v39 }
  0xf4   :  { %856 = vmatpush.bf16.msrb.mxu3 %v3175_v5  ;;  %v3200_v5 = vld [vmem:[#allocation9 + $0x18] sm:$0xff] }
  0xf5   :  { %983 = vmatpush.bf16.msra.mxu1 %v3193_v31  ;;  %841 = vmatpush.bf16.msrb.mxu2 %v3169_v33 }
  0xf6   :  { %972 = vmatpush.bf16.msra.mxu0 %v3183_v62 }
  0xf9   :  { %984 = vmatpush.bf16.msra.mxu1 %v3192_v40 }
  0xfa   :  { %973 = vmatpush.bf16.msra.mxu0 %v3182_v2  ;;  %v3202_v2 = vld [vmem:[#allocation9 + $0x28] sm:$0xff] }
  0xfd   :  { %985 = vmatpush.bf16.msra.mxu1 %v3191_v63  ;;  %v3204_v63 = vld [vmem:[#allocation9 + $0x38] sm:$0xff] }
 0x101   :  { %986 = vmatpush.bf16.msra.mxu1 %v3190_v3  ;;  %v3211_v3 = vld [vmem:[#allocation9 + $0x70] sm:$0xff] }
 0x144   :  { %v340_v43 = vpop.xlane.xlu1 %339 }
 0x145   :  { %v342_v42 = vpop.xlane.xlu0 %341  ;;  %v3726_v47 = vmul.f32 0.0078125, %v340_v43 }
 0x146   :  { %v3728_v0 = vmul.f32 0.0078125, %v342_v42 }
 0x147   :  { %v353_v6 = vmul.f32 %v3726_v47, %v3726_v47  ;;  %v357_v51 = vsub.f32 %v3716_v26, %v3726_v47 }
 0x148   :  { %v354_v9 = vmul.f32 %v3728_v0, %v3728_v0  ;;  %v358_v48 = vsub.f32 %v3718_v27, %v3728_v0  ;;  %v3317_v27 = vld [vmem:[%s3934_s9 + $0x1] ss:$0 sm:$0xff]  ;;  %v3168_v0 = vld [vmem:[#allocation8 + $0x18] sm:$0xff] }
 0x149   :  { %842 = vmatpush.bf16.msrb.mxu2 %v3168_v0  ;;  %v3203_v0 = vld [vmem:[#allocation9 + $0x30] sm:$0xff] }
 0x14c   :  { %v346_v8 = vpop.xlane.xlu1 %345 }
 0x14d   :  { %v348_v7 = vpop.xlane.xlu0 %347  ;;  %v351_v11 = vmul.f32 0.0078125, %v346_v8  ;;  %843 = vmatpush.bf16.msrb.mxu2 %v3167_v4  ;;  %v3166_v8 = vld [vmem:[#allocation8 + $0x8] sm:$0xff] }
 0x14e   :  { %v352_v10 = vmul.f32 0.0078125, %v348_v7  ;;  %v3189_v7 = vld [vmem:[#allocation8 + $0xc0] sm:$0xff]  ;;  %v3210_v4 = vld [vmem:[#allocation9 + $0x68] sm:$0xff] }
 0x14f   :  { %v355_v15 = vsub.f32 %v351_v11, %v353_v6  ;;  %v3181_v6 = vld [vmem:[#allocation8 + $0x80] sm:$0xff]  ;;  %987 = vmatpush.bf16.msra.mxu1 %v3189_v7  ;;  %v3199_v7 = vld [vmem:[#allocation9 + $0x10] sm:$0xff] }
 0x150   :  { %v356_v14 = vsub.f32 %v352_v10, %v354_v9  ;;  %974 = vmatpush.bf16.msra.mxu0 %v3181_v6  ;;  %v3174_v9 = vld [vmem:[#allocation8 + $0x48] sm:$0xff]  ;;  %v3165_v10 = vld [vmem:[#allocation8] sm:$0xff] }
 0x151   :  { %v359_v21 = vadd.f32 1e-06, %v355_v15  ;;  %844 = vmatpush.bf16.msrb.mxu2 %v3166_v8  ;;  %857 = vmatpush.bf16.msrb.mxu3 %v3174_v9  ;;  %v3173_v11 = vld [vmem:[#allocation8 + $0x40] sm:$0xff]  ;;  %v3208_v8 = vld [vmem:[#allocation9 + $0x58] sm:$0xff] }
 0x152   :  { %v360_v20 = vadd.f32 1e-06, %v356_v14  ;;  %v440_v14 = vperm.slane %v434_v12, 1  ;;  %v3209_v6 = vld [vmem:[#allocation9 + $0x60] sm:$0xff] }
 0x153   :  { %vm367_vm0 = vweird.f32 %v359_v21 }
 0x154   :  { %3344 = vrsqrt.f32 %v360_v20  ;;  %vm377_vm3 = vweird.f32 %v360_v20 }
 0x155   :  { %3346 = vrsqrt.f32 %v359_v21  ;;  %845 = vmatpush.bf16.msrb.mxu2 %v3165_v10  ;;  %858 = vmatpush.bf16.msrb.mxu3 %v3173_v11  ;;  %v3198_v10 = vld [vmem:[#allocation9 + $0x8] sm:$0xff]  ;;  %v3207_v11 = vld [vmem:[#allocation9 + $0x50] sm:$0xff] }
 0x15a   :  { %v3345_v32 = vpop.eup %3344 }
 0x15b   :  { %v3347_v35 = vpop.eup %3346  ;;  %v372_v36 = vmul.f32 %v3345_v32, %v360_v20  ;;  %vm378_vm2 = vweird.f32 %v3345_v32 }
 0x15c   :  { %v362_v37 = vmul.f32 %v3347_v35, %v359_v21  ;;  %vm368_vm1 = vweird.f32 %v3347_v35  ;;  %vm379_vm5 = vmor %vm377_vm3, %vm378_vm2 }
 0x15d   :  { %v373_v38 = vmul.f32 %v3345_v32, %v372_v36  ;;  %vm369_vm4 = vmor %vm367_vm0, %vm368_vm1 }
 0x15e   :  { %v363_v41 = vmul.f32 %v3347_v35, %v362_v37 }
 0x15f   :  { %v374_v42 = vmul.f32 0.5, %v373_v38 }
 0x160   :  { %v364_v43 = vmul.f32 0.5, %v363_v41 }
 0x161   :  { %v375_v44 = vsub.f32 1.5, %v374_v42 }
 0x162   :  { %v365_v45 = vsub.f32 1.5, %v364_v43 }
 0x163   :  { %v376_v46 = vmul.f32 %v3345_v32, %v375_v44 }
 0x164   :  { %v366_v49 = vmul.f32 %v3347_v35, %v365_v45 }
 0x165   :  { %v380_v52 = vsel %vm379_vm5, %v3345_v32, %v376_v46  ;;  %v3318_v46 = vld [vmem:[%s3932_s7 + $0x1] ss:$0 sm:$0xff] }
 0x166   :  { %v370_v54 = vsel %vm369_vm4, %v3347_v35, %v366_v49  ;;  %v382_v55 = vmul.f32 %v380_v52, %v358_v48 }
 0x167   :  { %v381_v56 = vmul.f32 %v370_v54, %v357_v51 }
 0x168   :  { %v390_v58 = vmul.f32 %v3316_v50, %v382_v55  ;;  %v3319_v55 = vld [vmem:[%s3932_s7] ss:$0 sm:$0xff] }
 0x169   :  { %v389_v59 = vmul.f32 %v3314_v53, %v381_v56 }
 0x16a   :  { %v3750_v60 = vadd.f32 %v3317_v27, %v390_v58 }
 0x16b   :  { %v3752_v26 = vadd.f32 %v3315_v57, %v389_v59 }
 0x16c   :  { %v432_v47 = vpack.c.bf16 %v3750_v60, %v3750_v60 }
 0x16d   :  { %v431_v61 = vpack.c.bf16 %v3752_v26, %v3752_v26 }
 0x16e   :  { %639 = vmatmul.bf16.vlgmr.msrb.gmra.mxu0 %v432_v47  ;;  %652 = vmatmul.bf16.vlgmr.msrb.gmra.mxu1 %v432_v47 }
 0x16f   :  { %533 = vmatmul.bf16.vlgmr.msra.gmra.mxu2 %v431_v61  ;;  %546 = vmatmul.bf16.vlgmr.msra.gmra.mxu3 %v431_v61 }
 0x170   :  { %1151 = vmatpush.bf16.msra.mxu2 %v3204_v63  ;;  %1212 = vmatpush.bf16.msra.mxu3 %v3212_v1 }
 0x174   :  { %1152 = vmatpush.bf16.msra.mxu2 %v3203_v0  ;;  %1213 = vmatpush.bf16.msra.mxu3 %v3211_v3 }
 0x178   :  { %1153 = vmatpush.bf16.msra.mxu2 %v3202_v2  ;;  %1214 = vmatpush.bf16.msra.mxu3 %v3210_v4 }
 0x17c   :  { %1215 = vmatpush.bf16.msra.mxu3 %v3209_v6  ;;  %v2808_v6 = vld [vmem:[#allocation11 + $0x70] sm:$0xf] }
 0x180   :  { %1216 = vmatpush.bf16.msra.mxu3 %v3208_v8  ;;  %v2800_v8 = vld [vmem:[#allocation11 + $0x60] sm:$0xf] }
 0x184   :  { %1217 = vmatpush.bf16.msra.mxu3 %v3207_v11 }
 0x1eb   :  { %v640_v15 = vpop.f32.mrf.mxu0  ;;  %v653_v16 = vpop.f32.mrf.mxu1 }
 0x1ec   :  { %v641_v17 = vadd.f32 %v640_v15, %v439_v13  ;;  %v654_v18 = vadd.f32 %v653_v16, %v440_v14  ;;  %v3197_v13 = vld [vmem:[#allocation9] sm:$0xff]  ;;  %v3206_v14 = vld [vmem:[#allocation9 + $0x48] sm:$0xff] }
 0x1ed   :  { %1218 = vmatpush.bf16.msra.mxu3 %v3206_v14  ;;  %v3224_v14 = vld [vmem:[#allocation11 + $0x54] sm:$0xf0] }
 0x1ee   :  { %v659_v20 = vmax.f32 %v641_v17, 0.0  ;;  %v660_v21 = vmax.f32 %v654_v18, 0.0  ;;  %v3205_v18 = vld [vmem:[#allocation9 + $0x40] sm:$0xff] }
 0x1f0   :  { %v726_v24 = vpack.c.bf16 %v660_v21, %v659_v20 }
 0x1f1   :  { %1219 = vmatpush.bf16.msra.mxu3 %v3205_v18 }
 0x1f2   :  { %v865_v25 = vunpack.c.l.b16 %v726_v24  ;;  %v866_v28 = vunpack.c.h.b16 %v726_v24  ;;  %v534_v29 = vpop.f32.mrf.mxu2  ;;  %v547_v30 = vpop.f32.mrf.mxu3 }
 0x1f3   :  { %v535_v31 = vadd.f32 %v534_v29, %v437_v22  ;;  %v548_v32 = vadd.f32 %v547_v30, %v438_v23  ;;  %v642_v33 = vpop.f32.mrf.mxu0  ;;  %v655_v34 = vpop.f32.mrf.mxu1 }
 0x1f4   :  { %v867_v35 = vpack.c.b16 %v865_v25, %v865_v25  ;;  %v868_v36 = vpack.c.b16 %v866_v28, %v866_v28 }
 0x1f5   :  { %v657_v37 = vmax.f32 %v535_v31, 0.0  ;;  %v658_v38 = vmax.f32 %v548_v32, 0.0 }
 0x1f6   :  { %975 = vmatmul.bf16.vlgmr.msra.gmra.mxu0 %v867_v35  ;;  %988 = vmatmul.bf16.vlgmr.msra.gmra.mxu1 %v868_v36 }
 0x1f7   :  { %v725_v39 = vpack.c.bf16 %v658_v38, %v657_v37 }
 0x1f9   :  { %v736_v40 = vunpack.c.l.b16 %v725_v39  ;;  %v737_v41 = vunpack.c.h.b16 %v725_v39 }
 0x1fa   :  { %v536_v42 = vpop.f32.mrf.mxu2  ;;  %v549_v43 = vpop.f32.mrf.mxu3 }
 0x1fb   :  { %v738_v44 = vpack.c.b16 %v736_v40, %v736_v40  ;;  %v739_v45 = vpack.c.b16 %v737_v41, %v737_v41  ;;  %v3320_v40 = vld [vmem:[%s3933_s8 + $0x3] ss:$0 sm:$0xff] }
 0x1fd   :  { %846 = vmatmul.bf16.vlgmr.msrb.gmra.mxu2 %v738_v44  ;;  %859 = vmatmul.bf16.vlgmr.msrb.gmra.mxu3 %v739_v45  ;;  %v3321_v44 = vld [vmem:[%s3934_s9 + $0x3] ss:$0 sm:$0xff] }
 0x273   :  { %v976_v48 = vpop.f32.mrf.mxu0  ;;  %v989_v49 = vpop.f32.mrf.mxu1 }
 0x274   :  { %v977_v50 = vadd.f32 %v3318_v46, %v976_v48 }
 0x276   :  { %v990_v51 = vadd.f32 %v989_v49, %v977_v50 }
 0x278   :  { %v3768_v52 = vadd.f32 %v990_v51, %v3750_v60  ;;  %v3322_v51 = vld [vmem:[%s3933_s8 + $0x2] ss:$0 sm:$0xff] }
 0x27a   :  { %1003 = vadd.xlane.f32.xlu2 %v3768_v52  ;;  %v1006_v57 = vmul.f32 %v3768_v52, %v3768_v52 }
 0x27b   :  { %v978_v53 = vpop.f32.mrf.mxu0  ;;  %v991_v54 = vpop.f32.mrf.mxu1 }
 0x280   :  { %v847_v27 = vpop.f32.mrf.mxu2  ;;  %v860_v56 = vpop.f32.mrf.mxu3 }
 0x281   :  { %v848_v58 = vadd.f32 %v3319_v55, %v847_v27  ;;  %v3323_v55 = vld [vmem:[%s3934_s9 + $0x2] ss:$0 sm:$0xff] }
 0x282   :  { %1009 = vadd.xlane.f32.xlu2 %v1006_v57 }
 0x283   :  { %v861_v59 = vadd.f32 %v860_v56, %v848_v58  ;;  %v3324_v58 = vld [vmem:[%s3936_s11] ss:$0 sm:$0xff] }
 0x285   :  { %v3777_v47 = vadd.f32 %v861_v59, %v3752_v26  ;;  %v3201_v26 = vld [vmem:[#allocation9 + $0x20] sm:$0xff] }
 0x286   :  { %1154 = vmatpush.bf16.msra.mxu2 %v3201_v26 }
 0x287   :  { %1001 = vadd.xlane.f32.xlu0 %v3777_v47  ;;  %v1005_v60 = vmul.f32 %v3777_v47, %v3777_v47 }
 0x288   :  { %v849_v61 = vpop.f32.mrf.mxu2  ;;  %v862_v62 = vpop.f32.mrf.mxu3 }
 0x289   :  { %1007 = vadd.xlane.f32.xlu1 %v1005_v60 }
 0x28a   :  { %1155 = vmatpush.bf16.msra.mxu2 %v3200_v5 }
 0x28e   :  { %1156 = vmatpush.bf16.msra.mxu2 %v3199_v7  ;;  %v3228_v7 = vld [vmem:[#allocation11 + $0x74] sm:$0xf0] }
 0x292   :  { %1157 = vmatpush.bf16.msra.mxu2 %v3198_v10  ;;  %v3226_v10 = vld [vmem:[#allocation11 + $0x64] sm:$0xf0] }
 0x296   :  { %1158 = vmatpush.bf16.msra.mxu2 %v3197_v13  ;;  %v2792_v13 = vld [vmem:[#allocation11 + $0x50] sm:$0xf] }
 0x2ed   :  { %v1004_v9 = vpop.xlane.xlu2 %1003 }
 0x2ee   :  { %v1012_v12 = vmul.f32 0.0078125, %v1004_v9  ;;  %v2809_v9 = vor.u32 %v3228_v7, %v2808_v6  ;;  %v3215_v6 = vld [vmem:[#allocation11 + $0x14] sm:$0xf]  ;;  %v2762_v7 = vld [vmem:[#allocation11 + $0x18] sm:$0xf0] }
 0x2f0   :  { %v1016_v16 = vmul.f32 %v1012_v12, %v1012_v12  ;;  %v1020_v38 = vsub.f32 %v3768_v52, %v1012_v12  ;;  %1396 = vmatpush.bf16.msrb.mxu0 %v2809_v9  ;;  %v2801_v12 = vor.u32 %v3226_v10, %v2800_v8  ;;  %v2765_v8 = vor.u32 %v3215_v6, %v2762_v7  ;;  %v3250_v9 = vld [vmem:[#allocation9 + $0xa8] sm:$0xff]  ;;  %v3213_v10 = vld [vmem:[#allocation11 + $0x4] sm:$0xf] }
 0x2f4   :  { %1397 = vmatpush.bf16.msrb.mxu0 %v2801_v12 }
 0x2f5   :  { %v1010_v15 = vpop.xlane.xlu2 %1009 }
 0x2f6   :  { %v1014_v17 = vmul.f32 0.0078125, %v1010_v15  ;;  %v2793_v15 = vor.u32 %v3224_v14, %v2792_v13  ;;  %v3249_v13 = vld [vmem:[#allocation9 + $0xa0] sm:$0xff] }
 0x2f8   :  { %v1018_v19 = vsub.f32 %v1014_v17, %v1016_v16  ;;  %1398 = vmatpush.bf16.msrb.mxu0 %v2793_v15 }
 0x2fa   :  { %v1022_v20 = vadd.f32 1e-06, %v1018_v19  ;;  %v1002_v21 = vpop.xlane.xlu0 %1001 }
 0x2fb   :  { %v1011_v22 = vmul.f32 0.0078125, %v1002_v21 }
 0x2fc   :  { %3348 = vrsqrt.f32 %v1022_v20  ;;  %v1008_v23 = vpop.xlane.xlu1 %1007  ;;  %vm1039_vm7 = vweird.f32 %v1022_v20 }
 0x2fd   :  { %v1015_v24 = vmul.f32 %v1011_v22, %v1011_v22  ;;  %v1013_v25 = vmul.f32 0.0078125, %v1008_v23  ;;  %v1019_v50 = vsub.f32 %v3777_v47, %v1011_v22  ;;  %v3326_v23 = vld [vmem:[%s3941_s16] ss:$0 sm:$0xff] }
 0x2ff   :  { %v1017_v28 = vsub.f32 %v1013_v25, %v1015_v24  ;;  %v3325_v25 = vld [vmem:[%s3936_s11 + $0x1] ss:$0 sm:$0xff] }
 0x301   :  { %v1021_v29 = vadd.f32 1e-06, %v1017_v28 }
 0x302   :  { %v3349_v30 = vpop.eup %3348 }
 0x303   :  { %v1034_v31 = vmul.f32 %v3349_v30, %v1022_v20  ;;  %3350 = vrsqrt.f32 %v1021_v29  ;;  %vm1040_vm6 = vweird.f32 %v3349_v30  ;;  %vm1029_vm10 = vweird.f32 %v1021_v29 }
 0x304   :  { %vm1041_vm8 = vmor %vm1039_vm7, %vm1040_vm6 }
 0x305   :  { %v1035_v32 = vmul.f32 %v3349_v30, %v1034_v31 }
 0x307   :  { %v1036_v33 = vmul.f32 0.5, %v1035_v32 }
 0x309   :  { %v3351_v34 = vpop.eup %3350  ;;  %v1037_v35 = vsub.f32 1.5, %v1036_v33 }
 0x30a   :  { %v1024_v36 = vmul.f32 %v3351_v34, %v1021_v29  ;;  %vm1030_vm9 = vweird.f32 %v3351_v34  ;;  %v3327_v29 = vld [vmem:[%s3942_s17] ss:$0 sm:$0xff] }
 0x30b   :  { %v1038_v37 = vmul.f32 %v3349_v30, %v1037_v35  ;;  %vm1031_vm11 = vmor %vm1029_vm10, %vm1030_vm9  ;;  %v2784_v35 = vld [vmem:[#allocation11 + $0x40] sm:$0xf] }
 0x30c   :  { %v1025_v39 = vmul.f32 %v3351_v34, %v1024_v36  ;;  %v3222_v36 = vld [vmem:[#allocation11 + $0x44] sm:$0xf0] }
 0x30d   :  { %v1042_v41 = vsel %vm1041_vm8, %v3349_v30, %v1038_v37  ;;  %v2785_v37 = vor.u32 %v3222_v36, %v2784_v35  ;;  %v3243_v35 = vld [vmem:[#allocation12 + $0x70] sm:$0xff] }
 0x30e   :  { %v1044_v42 = vmul.f32 %v1042_v41, %v1020_v38  ;;  %v1026_v43 = vmul.f32 0.5, %v1025_v39  ;;  %v3227_v38 = vld [vmem:[#allocation11 + $0x74] sm:$0xf]  ;;  %v2810_v39 = vld [vmem:[#allocation11 + $0x78] sm:$0xf0] }
 0x30f   :  { %1399 = vmatpush.bf16.msrb.mxu0 %v2785_v37  ;;  %v2776_v41 = vld [vmem:[#allocation11 + $0x30] sm:$0xf] }
 0x310   :  { %v1027_v45 = vsub.f32 1.5, %v1026_v43  ;;  %v1052_v46 = vmul.f32 %v3320_v40, %v1044_v42  ;;  %v2813_v40 = vor.u32 %v3227_v38, %v2810_v39  ;;  %v3220_v42 = vld [vmem:[#allocation11 + $0x34] sm:$0xf0]  ;;  %v3328_v38 = vld [vmem:[%s3941_s16 + $0x1] ss:$0 sm:$0xff] }
 0x311   :  { %v2777_v43 = vor.u32 %v3220_v42, %v2776_v41  ;;  %v3242_v41 = vld [vmem:[#allocation12 + $0x68] sm:$0xff] }
 0x312   :  { %v1028_v48 = vmul.f32 %v3351_v34, %v1027_v45  ;;  %v1060_v49 = vadd.f32 %v3321_v44, %v1052_v46  ;;  %1409 = vmatpush.bf16.msrb.mxu1 %v2813_v40  ;;  %v3225_v44 = vld [vmem:[#allocation11 + $0x64] sm:$0xf]  ;;  %v2802_v45 = vld [vmem:[#allocation11 + $0x68] sm:$0xf0] }
 0x313   :  { %v2805_v46 = vor.u32 %v3225_v44, %v2802_v45  ;;  %1400 = vmatpush.bf16.msrb.mxu0 %v2777_v43  ;;  %v3234_v40 = vld [vmem:[#allocation12 + $0x28] sm:$0xff]  ;;  %v3329_v44 = vld [vmem:[%s3942_s17 + $0x1] ss:$0 sm:$0xff] }
 0x314   :  { %v1032_v52 = vsel %vm1031_vm11, %v3351_v34, %v1028_v48  ;;  %v1093_v53 = vpack.c.bf16 %v1060_v49, %v1060_v49  ;;  %v2768_v48 = vld [vmem:[#allocation11 + $0x20] sm:$0xf] }
 0x315   :  { %v1043_v54 = vmul.f32 %v1032_v52, %v1019_v50  ;;  %v2794_v52 = vld [vmem:[#allocation11 + $0x58] sm:$0xf0] }
 0x316   :  { %1159 = vmatmul.bf16.vlgmr.msra.gmra.mxu2 %v1093_v53  ;;  %1410 = vmatpush.bf16.msrb.mxu1 %v2805_v46  ;;  %v3233_v46 = vld [vmem:[#allocation12 + $0x20] sm:$0xff] }
 0x317   :  { %v1051_v27 = vmul.f32 %v3322_v51, %v1043_v54  ;;  %v3223_v51 = vld [vmem:[#allocation11 + $0x54] sm:$0xf]  ;;  %v2760_v54 = vld [vmem:[#allocation11 + $0x10] sm:$0xf] }
 0x318   :  { %v2797_v53 = vor.u32 %v3223_v51, %v2794_v52  ;;  %v3240_v51 = vld [vmem:[#allocation12 + $0x58] sm:$0xff]  ;;  %v3231_v52 = vld [vmem:[#allocation12 + $0x10] sm:$0xff] }
 0x319   :  { %v3796_v56 = vadd.f32 %v3323_v55, %v1051_v27  ;;  %v3216_v55 = vld [vmem:[#allocation11 + $0x14] sm:$0xf0] }
 0x31a   :  { %1411 = vmatpush.bf16.msrb.mxu1 %v2797_v53  ;;  %v2761_v27 = vor.u32 %v3216_v55, %v2760_v54  ;;  %v3239_v53 = vld [vmem:[#allocation12 + $0x50] sm:$0xff]  ;;  %v3230_v54 = vld [vmem:[#allocation12 + $0x8] sm:$0xff] }
 0x31b   :  { %v3800_v57 = vpack.c.bf16 %v3796_v56, %v3796_v56  ;;  %v3238_v55 = vld [vmem:[#allocation12 + $0x48] sm:$0xff] }
 0x31d   :  { %1220 = vmatmul.bf16.vlgmr.msra.gmra.mxu3 %v3800_v57 }
 0x399   :  { %v1160_v59 = vpop.f32.mrf.mxu2 }
 0x39a   :  { %v1161_v47 = vadd.f32 %v3324_v58, %v1160_v59  ;;  %v3221_v58 = vld [vmem:[#allocation11 + $0x44] sm:$0xf]  ;;  %v2786_v59 = vld [vmem:[#allocation11 + $0x48] sm:$0xf0] }
 0x39c   :  { %v1225_v60 = vadd.f32 %v1161_v47, %v1060_v49  ;;  %v3218_v49 = vld [vmem:[#allocation11 + $0x24] sm:$0xf0]  ;;  %v2789_v47 = vor.u32 %v3221_v58, %v2786_v59  ;;  %v3237_v58 = vld [vmem:[#allocation12 + $0x40] sm:$0xff] }
 0x39d   :  { %v2769_v50 = vor.u32 %v3218_v49, %v2768_v48  ;;  %v3241_v48 = vld [vmem:[#allocation12 + $0x60] sm:$0xff] }
 0x39e   :  { %1228 = vadd.xlane.f32.xlu2 %v1225_v60  ;;  %v1230_v61 = vmul.f32 %v1225_v60, %v1225_v60  ;;  %1412 = vmatpush.bf16.msrb.mxu1 %v2789_v47  ;;  %v1310_v59 = vld [vmem:[%s3938_s13] sm:$0x3] }
 0x39f   :  { %1401 = vmatpush.bf16.msrb.mxu0 %v2769_v50  ;;  %v1312_v47 = vperm.slane %v1310_v59, 0 }
 0x3a0   :  { %v1221_v62 = vpop.f32.mrf.mxu3  ;;  %1231 = vadd.xlane.f32.xlu0 %v1230_v61  ;;  %v3214_v61 = vld [vmem:[#allocation11 + $0x4] sm:$0xf0] }
 0x3a1   :  { %v1162_v63 = vpop.f32.mrf.mxu2  ;;  %v1222_v31 = vadd.f32 %v3325_v25, %v1221_v62 }
 0x3a2   :  { %v3219_v63 = vld [vmem:[#allocation11 + $0x34] sm:$0xf] }
 0x3a3   :  { %1402 = vmatpush.bf16.msrb.mxu0 %v2761_v27  ;;  %v3229_v27 = vld [vmem:[#allocation12] sm:$0xff] }
 0x3a8   :  { %v1223_v0 = vpop.f32.mrf.mxu3 }
 0x3a9   :  { %v2778_v0 = vld [vmem:[#allocation11 + $0x38] sm:$0xf0] }
 0x411   :  { %v1229_v1 = vpop.xlane.xlu2 %1228 }
 0x412   :  { %v1233_v2 = vmul.f32 0.0078125, %v1229_v1  ;;  %v2781_v1 = vor.u32 %v3219_v63, %v2778_v0 }
 0x413   :  { %v1232_v3 = vpop.xlane.xlu0 %1231 }
 0x414   :  { %v1235_v26 = vmul.f32 %v1233_v2, %v1233_v2  ;;  %v1234_v4 = vmul.f32 0.0078125, %v1232_v3  ;;  %v1237_v22 = vsub.f32 %v1225_v60, %v1233_v2  ;;  %v2752_v60 = vld [vmem:[#allocation11] sm:$0xf]  ;;  %v3252_v2 = vld [vmem:[#allocation9 + $0xb8] sm:$0xff]  ;;  %1413 = vmatpush.bf16.msrb.mxu1 %v2781_v1  ;;  %v3217_v3 = vld [vmem:[#allocation11 + $0x24] sm:$0xf] }
 0x415   :  { %v2753_v62 = vor.u32 %v3214_v61, %v2752_v60  ;;  %v1313_v60 = vperm.slane %v1310_v59, 1 }
 0x416   :  { %v1236_v5 = vsub.f32 %v1234_v4, %v1235_v26  ;;  %v2770_v26 = vld [vmem:[#allocation11 + $0x28] sm:$0xf0] }
 0x417   :  { %1403 = vmatpush.bf16.msrb.mxu0 %v2753_v62  ;;  %v2773_v4 = vor.u32 %v3217_v3, %v2770_v26 }
 0x418   :  { %v1238_v11 = vadd.f32 1e-06, %v1236_v5  ;;  %v3251_v5 = vld [vmem:[#allocation9 + $0xb0] sm:$0xff] }
 0x419   :  { %1414 = vmatpush.bf16.msrb.mxu1 %v2773_v4 }
 0x41a   :  { %3352 = vrsqrt.f32 %v1238_v11  ;;  %vm1245_vm13 = vweird.f32 %v1238_v11 }
 0x41b   :  { %1710 = vmatpush.bf16.msra.mxu0 %v3252_v2 }
 0x41d   :  { %1415 = vmatpush.bf16.msrb.mxu1 %v2765_v8 }
 0x41f   :  { %1711 = vmatpush.bf16.msra.mxu0 %v3251_v5  ;;  %v3330_v5 = vld [vmem:[%s3936_s11 + $0x2] ss:$0 sm:$0xff] }
 0x420   :  { %v3353_v16 = vpop.eup %3352 }
 0x421   :  { %v1240_v17 = vmul.f32 %v3353_v16, %v1238_v11  ;;  %vm1246_vm12 = vweird.f32 %v3353_v16  ;;  %v2754_v11 = vld [vmem:[#allocation11 + $0x8] sm:$0xf0] }
 0x422   :  { %vm1247_vm14 = vmor %vm1245_vm13, %vm1246_vm12  ;;  %v2757_v12 = vor.u32 %v3213_v10, %v2754_v11  ;;  %v3331_v10 = vld [vmem:[%s3940_s15] ss:$0 sm:$0xff] }
 0x423   :  { %v1241_v18 = vmul.f32 %v3353_v16, %v1240_v17  ;;  %1712 = vmatpush.bf16.msra.mxu0 %v3250_v9 }
 0x424   :  { %1416 = vmatpush.bf16.msrb.mxu1 %v2757_v12 }
 0x425   :  { %v1242_v19 = vmul.f32 0.5, %v1241_v18 }
 0x427   :  { %v1243_v20 = vsub.f32 1.5, %v1242_v19  ;;  %1713 = vmatpush.bf16.msra.mxu0 %v3249_v13  ;;  %v3248_v19 = vld [vmem:[#allocation9 + $0x98] sm:$0xff] }
 0x429   :  { %v1244_v21 = vmul.f32 %v3353_v16, %v1243_v20 }
 0x42b   :  { %v1248_v24 = vsel %vm1247_vm14, %v3353_v16, %v1244_v21  ;;  %1714 = vmatpush.bf16.msra.mxu0 %v3248_v19  ;;  %v3247_v21 = vld [vmem:[#allocation9 + $0x90] sm:$0xff]  ;;  %v3260_v19 = vld [vmem:[#allocation9 + $0xf8] sm:$0xff] }
 0x42c   :  { %v1249_v28 = vmul.f32 %v1248_v24, %v1237_v22  ;;  %v3245_v24 = vld [vmem:[#allocation9 + $0x80] sm:$0xff]  ;;  %1771 = vmatpush.bf16.msra.mxu1 %v3260_v19 }
 0x42e   :  { %v1253_v30 = vmul.f32 %v3326_v23, %v1249_v28  ;;  %v3246_v23 = vld [vmem:[#allocation9 + $0x88] sm:$0xff] }
 0x42f   :  { %1715 = vmatpush.bf16.msra.mxu0 %v3247_v21  ;;  %v3258_v21 = vld [vmem:[#allocation9 + $0xe8] sm:$0xff] }
 0x430   :  { %v1257_v32 = vadd.f32 %v3327_v29, %v1253_v30  ;;  %v3236_v30 = vld [vmem:[#allocation12 + $0x38] sm:$0xff] }
 0x431   :  { %1558 = vmatpush.bf16.msrb.mxu2 %v3236_v30 }
 0x432   :  { %v3815_v33 = vadd.f32 %v1257_v32, %v1222_v31  ;;  %v3244_v31 = vld [vmem:[#allocation12 + $0x78] sm:$0xff] }
 0x433   :  { %1716 = vmatpush.bf16.msra.mxu0 %v3246_v23  ;;  %1571 = vmatpush.bf16.msrb.mxu3 %v3244_v31  ;;  %v3256_v23 = vld [vmem:[#allocation9 + $0xd8] sm:$0xff] }
 0x434   :  { %1263 = vadd.xlane.f32.xlu1 %v3815_v33  ;;  %v1265_v34 = vmul.f32 %v3815_v33, %v3815_v33 }
 0x436   :  { %1266 = vadd.xlane.f32.xlu2 %v1265_v34  ;;  %v3235_v34 = vld [vmem:[#allocation12 + $0x30] sm:$0xff] }
 0x437   :  { %1717 = vmatpush.bf16.msra.mxu0 %v3245_v24  ;;  %1559 = vmatpush.bf16.msrb.mxu2 %v3235_v34  ;;  %v3255_v24 = vld [vmem:[#allocation9 + $0xd0] sm:$0xff] }
 0x438   :  { %1572 = vmatpush.bf16.msrb.mxu3 %v3243_v35 }
 0x43b   :  { %1560 = vmatpush.bf16.msrb.mxu2 %v3234_v40 }
 0x43c   :  { %1573 = vmatpush.bf16.msrb.mxu3 %v3242_v41 }
 0x43f   :  { %1561 = vmatpush.bf16.msrb.mxu2 %v3233_v46 }
 0x440   :  { %1574 = vmatpush.bf16.msrb.mxu3 %v3241_v48  ;;  %v3333_v48 = vld [vmem:[%s3942_s17 + $0x2] ss:$0 sm:$0xff] }
 0x444   :  { %1575 = vmatpush.bf16.msrb.mxu3 %v3240_v51 }
 0x448   :  { %1576 = vmatpush.bf16.msrb.mxu3 %v3239_v53 }
 0x44c   :  { %1577 = vmatpush.bf16.msrb.mxu3 %v3238_v55 }
 0x450   :  { %1578 = vmatpush.bf16.msrb.mxu3 %v3237_v58 }
 0x4a7   :  { %v1264_v14 = vpop.xlane.xlu1 %1263 }
 0x4a8   :  { %v1268_v15 = vmul.f32 0.0078125, %v1264_v14 }
 0x4a9   :  { %v1267_v16 = vpop.xlane.xlu2 %1266 }
 0x4aa   :  { %v1270_v17 = vmul.f32 %v1268_v15, %v1268_v15  ;;  %v1269_v18 = vmul.f32 0.0078125, %v1267_v16  ;;  %v1272_v39 = vsub.f32 %v3815_v33, %v1268_v15  ;;  %v3232_v33 = vld [vmem:[#allocation12 + $0x18] sm:$0xff] }
 0x4ab   :  { %1562 = vmatpush.bf16.msrb.mxu2 %v3232_v33 }
 0x4ac   :  { %v1271_v20 = vsub.f32 %v1269_v18, %v1270_v17 }
 0x4ae   :  { %v1273_v22 = vadd.f32 1e-06, %v1271_v20  ;;  %v3259_v20 = vld [vmem:[#allocation9 + $0xf0] sm:$0xff] }
 0x4af   :  { %1563 = vmatpush.bf16.msrb.mxu2 %v3231_v52  ;;  %1772 = vmatpush.bf16.msra.mxu1 %v3259_v20  ;;  %v3003_v20 = vld [vmem:[#allocation11 + $0xe8] sm:$0xf0] }
 0x4b0   :  { %3354 = vrsqrt.f32 %v1273_v22  ;;  %vm1280_vm0 = vweird.f32 %v1273_v22 }
 0x4b3   :  { %1564 = vmatpush.bf16.msrb.mxu2 %v3230_v54  ;;  %1773 = vmatpush.bf16.msra.mxu1 %v3258_v21 }
 0x4b6   :  { %v3355_v25 = vpop.eup %3354 }
 0x4b7   :  { %v1275_v28 = vmul.f32 %v3355_v25, %v1273_v22  ;;  %vm1281_vm15 = vweird.f32 %v3355_v25  ;;  %1565 = vmatpush.bf16.msrb.mxu2 %v3229_v27  ;;  %v3257_v22 = vld [vmem:[#allocation9 + $0xe0] sm:$0xff] }
 0x4b8   :  { %vm1282_vm1 = vmor %vm1280_vm0, %vm1281_vm15  ;;  %1774 = vmatpush.bf16.msra.mxu1 %v3257_v22  ;;  %v2993_v22 = vld [vmem:[#allocation11 + $0xd0] sm:$0xf] }
 0x4b9   :  { %v1276_v29 = vmul.f32 %v3355_v25, %v1275_v28  ;;  %v3253_v28 = vld [vmem:[#allocation9 + $0xc0] sm:$0xff] }
 0x4bb   :  { %v1277_v32 = vmul.f32 0.5, %v1276_v29 }
 0x4bc   :  { %1775 = vmatpush.bf16.msra.mxu1 %v3256_v23  ;;  %v3272_v23 = vld [vmem:[#allocation11 + $0xd4] sm:$0xf0] }
 0x4bd   :  { %v1278_v36 = vsub.f32 1.5, %v1277_v32 }
 0x4bf   :  { %v1279_v37 = vmul.f32 %v3355_v25, %v1278_v36 }
 0x4c0   :  { %1776 = vmatpush.bf16.msra.mxu1 %v3255_v24  ;;  %v3271_v24 = vld [vmem:[#allocation11 + $0xd4] sm:$0xf] }
 0x4c1   :  { %v1283_v42 = vsel %vm1282_vm1, %v3355_v25, %v1279_v37  ;;  %v3254_v25 = vld [vmem:[#allocation9 + $0xc8] sm:$0xff] }
 0x4c2   :  { %v1284_v43 = vmul.f32 %v1283_v42, %v1272_v39 }
 0x4c4   :  { %v1288_v45 = vmul.f32 %v3328_v38, %v1284_v43  ;;  %1777 = vmatpush.bf16.msra.mxu1 %v3254_v25  ;;  %v2994_v25 = vor.u32 %v3272_v23, %v2993_v22  ;;  %v3337_v22 = vld [vmem:[%s3941_s16 + $0x4] ss:$0 sm:$0xff] }
 0x4c6   :  { %v1292_v49 = vadd.f32 %v3329_v44, %v1288_v45  ;;  %v3332_v44 = vld [vmem:[%s3941_s16 + $0x2] ss:$0 sm:$0xff] }
 0x4c8   :  { %v1309_v50 = vpack.c.bf16 %v1292_v49, %v1292_v49  ;;  %1778 = vmatpush.bf16.msra.mxu1 %v3253_v28  ;;  %v2995_v28 = vld [vmem:[#allocation11 + $0xd8] sm:$0xf0] }
 0x4ca   :  { %1404 = vmatmul.bf16.vlgmr.msrb.gmra.mxu0 %v1309_v50  ;;  %1417 = vmatmul.bf16.vlgmr.msrb.gmra.mxu1 %v1309_v50 }
 0x4da   :  { %1718 = vmatmul.bf16.vlgmr.msra.gmra.mxu0 %v3800_v57 }
 0x547   :  { %v1405_v61 = vpop.f32.mrf.mxu0  ;;  %v1418_v62 = vpop.f32.mrf.mxu1 }
 0x548   :  { %v1406_v63 = vadd.f32 %v1405_v61, %v1312_v47  ;;  %v1419_v0 = vadd.f32 %v1418_v62, %v1313_v60 }
 0x54a   :  { %v1422_v1 = vmax.f32 %v1406_v63, 0.0  ;;  %v1423_v57 = vmax.f32 %v1419_v0, 0.0 }
 0x54c   :  { %v1456_v2 = vpack.c.bf16 %v1422_v1, %v1422_v1  ;;  %v1457_v3 = vpack.c.bf16 %v1423_v57, %v1423_v57 }
 0x54e   :  { %1566 = vmatmul.bf16.vlgmr.msrb.gmra.mxu2 %v1456_v2  ;;  %1579 = vmatmul.bf16.vlgmr.msrb.gmra.mxu3 %v1457_v3  ;;  %v3335_v2 = vld [vmem:[%s3941_s16 + $0x3] ss:$0 sm:$0xff] }
 0x54f   :  { %v1407_v26 = vpop.f32.mrf.mxu0  ;;  %v1420_v4 = vpop.f32.mrf.mxu1  ;;  %v3334_v3 = vld [vmem:[%s3936_s11 + $0x3] ss:$0 sm:$0xff] }
 0x550   :  { %v3336_v4 = vld [vmem:[%s3942_s17 + $0x3] ss:$0 sm:$0xff] }
 0x557   :  { %v1719_v6 = vpop.f32.mrf.mxu0 }
 0x558   :  { %v1720_v7 = vadd.f32 %v3330_v5, %v1719_v6 }
 0x55a   :  { %v3835_v8 = vadd.f32 %v1720_v7, %v3796_v56 }
 0x55c   :  { %1789 = vadd.xlane.f32.xlu2 %v3835_v8  ;;  %v1791_v56 = vmul.f32 %v3835_v8, %v3835_v8 }
 0x55f   :  { %v1721_v9 = vpop.f32.mrf.mxu0 }
 0x5cf   :  { %v1790_v51 = vpop.xlane.xlu2 %1789 }
 0x5d0   :  { %v1794_v53 = vmul.f32 0.0078125, %v1790_v51  ;;  %v3264_v51 = vld [vmem:[#allocation11 + $0x94] sm:$0xf0] }
 0x5d1   :  { %v1567_v11 = vpop.f32.mrf.mxu2  ;;  %v1580_v12 = vpop.f32.mrf.mxu3 }
 0x5d2   :  { %v1568_v13 = vadd.f32 %v3331_v10, %v1567_v11  ;;  %v1796_v55 = vmul.f32 %v1794_v53, %v1794_v53  ;;  %v1798_v1 = vsub.f32 %v3835_v8, %v1794_v53  ;;  %v3009_v11 = vld [vmem:[#allocation11 + $0xf0] sm:$0xf] }
 0x5d4   :  { %v1581_v14 = vadd.f32 %v1580_v12, %v1568_v13  ;;  %v3276_v12 = vld [vmem:[#allocation11 + $0xf4] sm:$0xf0]  ;;  %v3275_v13 = vld [vmem:[#allocation11 + $0xf4] sm:$0xf] }
 0x5d6   :  { %v1584_v15 = vadd.f32 %v1581_v14, %v1292_v49  ;;  %v3010_v14 = vor.u32 %v3276_v12, %v3009_v11  ;;  %v3289_v11 = vld [vmem:[#allocation12 + $0xe0] sm:$0xff] }
 0x5d8   :  { %1589 = vadd.xlane.f32.xlu0 %v1584_v15  ;;  %v1591_v16 = vmul.f32 %v1584_v15, %v1584_v15  ;;  %1959 = vmatpush.bf16.msra.mxu2 %v3010_v14  ;;  %v3280_v14 = vld [vmem:[#allocation12 + $0x98] sm:$0xff] }
 0x5d9   :  { %v1569_v17 = vpop.f32.mrf.mxu2  ;;  %v1582_v18 = vpop.f32.mrf.mxu3 }
 0x5da   :  { %1592 = vadd.xlane.f32.xlu1 %v1591_v16  ;;  %v3001_v17 = vld [vmem:[#allocation11 + $0xe0] sm:$0xf]  ;;  %v3274_v18 = vld [vmem:[#allocation11 + $0xe4] sm:$0xf0] }
 0x5db   :  { %v3002_v19 = vor.u32 %v3274_v18, %v3001_v17  ;;  %v3279_v18 = vld [vmem:[#allocation12 + $0x90] sm:$0xff] }
 0x5dd   :  { %1960 = vmatpush.bf16.msra.mxu2 %v3002_v19 }
 0x5e0   :  { %1792 = vadd.xlane.f32.xlu0 %v1791_v56  ;;  %v3273_v56 = vld [vmem:[#allocation11 + $0xe4] sm:$0xf] }
 0x5e1   :  { %v3006_v21 = vor.u32 %v3273_v56, %v3003_v20  ;;  %1961 = vmatpush.bf16.msra.mxu2 %v2994_v25  ;;  %v3287_v56 = vld [vmem:[#allocation12 + $0xd0] sm:$0xff]  ;;  %v3338_v25 = vld [vmem:[%s3942_s17 + $0x4] ss:$0 sm:$0xff] }
 0x64b   :  { %v1590_v29 = vpop.xlane.xlu0 %1589 }
 0x64c   :  { %v1594_v30 = vmul.f32 0.0078125, %v1590_v29  ;;  %v2998_v29 = vor.u32 %v3271_v24, %v2995_v28 }
 0x64d   :  { %v1593_v31 = vpop.xlane.xlu1 %1592 }
 0x64e   :  { %v1596_v32 = vmul.f32 %v1594_v30, %v1594_v30  ;;  %v1595_v34 = vmul.f32 0.0078125, %v1593_v31  ;;  %v1598_v43 = vsub.f32 %v1584_v15, %v1594_v30  ;;  %v3011_v15 = vld [vmem:[#allocation11 + $0xf8] sm:$0xf0]  ;;  %v2985_v30 = vld [vmem:[#allocation11 + $0xc0] sm:$0xf] }
 0x64f   :  { %v3014_v16 = vor.u32 %v3275_v13, %v3011_v15  ;;  %v3270_v31 = vld [vmem:[#allocation11 + $0xc4] sm:$0xf0]  ;;  %v3288_v15 = vld [vmem:[#allocation12 + $0xd8] sm:$0xff] }
 0x650   :  { %v1597_v35 = vsub.f32 %v1595_v34, %v1596_v32  ;;  %v3269_v32 = vld [vmem:[#allocation11 + $0xc4] sm:$0xf]  ;;  %v2986_v34 = vor.u32 %v3270_v31, %v2985_v30  ;;  %v3278_v31 = vld [vmem:[#allocation12 + $0x88] sm:$0xff] }
 0x651   :  { %1972 = vmatpush.bf16.msra.mxu3 %v3014_v16 }
 0x652   :  { %v1599_v36 = vadd.f32 1e-06, %v1597_v35  ;;  %v2987_v35 = vld [vmem:[#allocation11 + $0xc8] sm:$0xf0]  ;;  %1962 = vmatpush.bf16.msra.mxu2 %v2986_v34  ;;  %v3285_v34 = vld [vmem:[#allocation12 + $0xc0] sm:$0xff] }
 0x653   :  { %v1793_v52 = vpop.xlane.xlu0 %1792 }
 0x654   :  { %3356 = vrsqrt.f32 %v1599_v36  ;;  %vm1606_vm3 = vweird.f32 %v1599_v36  ;;  %v1795_v54 = vmul.f32 0.0078125, %v1793_v52  ;;  %v3263_v52 = vld [vmem:[#allocation11 + $0x94] sm:$0xf] }
 0x655   :  { %1973 = vmatpush.bf16.msra.mxu3 %v3006_v21 }
 0x656   :  { %v1797_v27 = vsub.f32 %v1795_v54, %v1796_v55  ;;  %v2963_v54 = vld [vmem:[#allocation11 + $0x98] sm:$0xf0]  ;;  %v2953_v55 = vld [vmem:[#allocation11 + $0x80] sm:$0xf] }
 0x658   :  { %v1799_v58 = vadd.f32 1e-06, %v1797_v27  ;;  %v3262_v27 = vld [vmem:[#allocation11 + $0x84] sm:$0xf0] }
 0x659   :  { %1974 = vmatpush.bf16.msra.mxu3 %v2998_v29 }
 0x65a   :  { %v3357_v37 = vpop.eup %3356  ;;  %3358 = vrsqrt.f32 %v1799_v58  ;;  %vm1806_vm6 = vweird.f32 %v1799_v58 }
 0x65b   :  { %v1601_v38 = vmul.f32 %v3357_v37, %v1599_v36  ;;  %vm1607_vm2 = vweird.f32 %v3357_v37  ;;  %v2990_v36 = vor.u32 %v3269_v32, %v2987_v35  ;;  %v3277_v32 = vld [vmem:[#allocation12 + $0x80] sm:$0xff] }
 0x65c   :  { %vm1608_vm4 = vmor %vm1606_vm3, %vm1607_vm2  ;;  %v2950_v35 = vld [vmem:[%s3938_s13 + $0x2] sm:$0x3] }
 0x65d   :  { %v1602_v39 = vmul.f32 %v3357_v37, %v1601_v38  ;;  %1975 = vmatpush.bf16.msra.mxu3 %v2990_v36  ;;  %v3268_v38 = vld [vmem:[#allocation11 + $0xb4] sm:$0xf0]  ;;  %v1875_v36 = vperm.slane %v2950_v35, 0 }
 0x65f   :  { %v1603_v40 = vmul.f32 0.5, %v1602_v39  ;;  %v3267_v39 = vld [vmem:[#allocation11 + $0xb4] sm:$0xf] }
 0x660   :  { %v3359_v59 = vpop.eup %3358 }
 0x661   :  { %v1604_v41 = vsub.f32 1.5, %v1603_v40  ;;  %v1801_v47 = vmul.f32 %v3359_v59, %v1799_v58  ;;  %vm1807_vm5 = vweird.f32 %v3359_v59  ;;  %v2966_v58 = vor.u32 %v3263_v52, %v2963_v54 }
 0x662   :  { %vm1808_vm7 = vmor %vm1806_vm6, %vm1807_vm5  ;;  %vm2312_vm6 = vcmask 523264  }
 0x663   :  { %v1605_v42 = vmul.f32 %v3357_v37, %v1604_v41  ;;  %v1802_v60 = vmul.f32 %v3359_v59, %v1801_v47  ;;  %v2979_v41 = vld [vmem:[#allocation11 + $0xb8] sm:$0xf0]  ;;  %v2955_v47 = vld [vmem:[#allocation11 + $0x88] sm:$0xf0] }
 0x665   :  { %v1609_v45 = vsel %vm1608_vm4, %v3357_v37, %v1605_v42  ;;  %v1803_v61 = vmul.f32 0.5, %v1802_v60  ;;  %v2977_v37 = vld [vmem:[#allocation11 + $0xb0] sm:$0xf]  ;;  %v2982_v42 = vor.u32 %v3267_v39, %v2979_v41  ;;  %v2954_v60 = vor.u32 %v3262_v27, %v2953_v55 }
 0x666   :  { %v1610_v46 = vmul.f32 %v1609_v45, %v1598_v43  ;;  %v2978_v40 = vor.u32 %v3268_v38, %v2977_v37  ;;  %v2969_v43 = vld [vmem:[#allocation11 + $0xa0] sm:$0xf]  ;;  %v3265_v45 = vld [vmem:[#allocation11 + $0xa4] sm:$0xf]  ;;  %v1876_v37 = vperm.slane %v2950_v35, 1 }
 0x667   :  { %v1804_v62 = vsub.f32 1.5, %v1803_v61  ;;  %1976 = vmatpush.bf16.msra.mxu3 %v2982_v42 }
 0x668   :  { %v1614_v49 = vmul.f32 %v3332_v44, %v1610_v46  ;;  %1963 = vmatpush.bf16.msra.mxu2 %v2978_v40  ;;  %v3266_v44 = vld [vmem:[#allocation11 + $0xa4] sm:$0xf0] }
 0x669   :  { %v1805_v63 = vmul.f32 %v3359_v59, %v1804_v62  ;;  %v2970_v46 = vor.u32 %v3266_v44, %v2969_v43 }
 0x66a   :  { %v3849_v50 = vadd.f32 %v3333_v48, %v1614_v49  ;;  %v2971_v48 = vld [vmem:[#allocation11 + $0xa8] sm:$0xf0] }
 0x66b   :  { %v1809_v0 = vsel %vm1808_vm7, %v3359_v59, %v1805_v63  ;;  %v2974_v49 = vor.u32 %v3265_v45, %v2971_v48  ;;  %v3261_v59 = vld [vmem:[#allocation11 + $0x84] sm:$0xf] }
 0x66c   :  { %v1652_v33 = vpack.c.bf16 %v3849_v50, %v3849_v50  ;;  %v1810_v57 = vmul.f32 %v1809_v0, %v1798_v1  ;;  %1964 = vmatpush.bf16.msra.mxu2 %v2970_v46  ;;  %v2958_v61 = vor.u32 %v3261_v59, %v2955_v47  ;;  %v3300_v59 = vld [vmem:[%s3943_s18 + $0x38] sm:$0xff]  ;;  %v3299_v47 = vld [vmem:[%s3943_s18 + $0x30] sm:$0xff] }
 0x66d   :  { %1977 = vmatpush.bf16.msra.mxu3 %v2974_v49  ;;  %v3339_v49 = vld [vmem:[%s3940_s15 + $0x1] ss:$0 sm:$0xff] }
 0x66e   :  { %1779 = vmatmul.bf16.vlgmr.msra.gmra.mxu1 %v1652_v33  ;;  %v1814_v26 = vmul.f32 %v3335_v2, %v1810_v57  ;;  %v2961_v33 = vld [vmem:[#allocation11 + $0x90] sm:$0xf]  ;;  %v3284_v2 = vld [vmem:[#allocation12 + $0xb8] sm:$0xff] }
 0x66f   :  { %v2962_v53 = vor.u32 %v3264_v51, %v2961_v33  ;;  %2123 = vmatpush.bf16.msrb.mxu0 %v3284_v2 }
 0x670   :  { %v1818_v7 = vadd.f32 %v3336_v4, %v1814_v26  ;;  %v3283_v4 = vld [vmem:[#allocation12 + $0xb0] sm:$0xff] }
 0x671   :  { %1965 = vmatpush.bf16.msra.mxu2 %v2962_v53  ;;  %1978 = vmatpush.bf16.msra.mxu3 %v2966_v58 }
 0x673   :  { %2124 = vmatpush.bf16.msrb.mxu0 %v3283_v4  ;;  %v3293_v4 = vld [vmem:[%s3943_s18] sm:$0xff] }
 0x675   :  { %1966 = vmatpush.bf16.msra.mxu2 %v2954_v60  ;;  %1979 = vmatpush.bf16.msra.mxu3 %v2958_v61  ;;  %v3298_v60 = vld [vmem:[%s3943_s18 + $0x28] sm:$0xff]  ;;  %v3082_v61 = vmul.f32 -1.442695, %v3849_v50 }
 0x679   :  { %2275 = vmatpush.bf16.msrb.mxu2 %v3300_v59 }
 0x67d   :  { %2276 = vmatpush.bf16.msrb.mxu2 %v3299_v47  ;;  %v2317_v47 = vstv %s3970_s23 }
 0x681   :  { %2277 = vmatpush.bf16.msrb.mxu2 %v3298_v60 }
 0x6eb   :  { %v1780_v5 = vpop.f32.mrf.mxu1 }
 0x6ec   :  { %v1781_v6 = vadd.f32 %v3334_v3, %v1780_v5  ;;  %v3292_v3 = vld [vmem:[#allocation12 + $0xf8] sm:$0xff]  ;;  %v3291_v5 = vld [vmem:[#allocation12 + $0xf0] sm:$0xff] }
 0x6ed   :  { %2136 = vmatpush.bf16.msrb.mxu1 %v3292_v3 }
 0x6ee   :  { %v3863_v9 = vadd.f32 %v1818_v7, %v1781_v6  ;;  %v3282_v7 = vld [vmem:[#allocation12 + $0xa8] sm:$0xff] }
 0x6ef   :  { %2125 = vmatpush.bf16.msrb.mxu0 %v3282_v7 }
 0x6f0   :  { %1824 = vadd.xlane.f32.xlu1 %v3863_v9  ;;  %v1826_v8 = vmul.f32 %v3863_v9, %v3863_v9 }
 0x6f1   :  { %2137 = vmatpush.bf16.msrb.mxu1 %v3291_v5 }
 0x6f2   :  { %1827 = vadd.xlane.f32.xlu2 %v1826_v8  ;;  %v3290_v8 = vld [vmem:[#allocation12 + $0xe8] sm:$0xff] }
 0x6f3   :  { %v1782_v10 = vpop.f32.mrf.mxu1 }
 0x6f4   :  { %v3281_v10 = vld [vmem:[#allocation12 + $0xa0] sm:$0xff] }
 0x6f5   :  { %2138 = vmatpush.bf16.msrb.mxu1 %v3290_v8  ;;  %2126 = vmatpush.bf16.msrb.mxu0 %v3281_v10 }
 0x6f9   :  { %2139 = vmatpush.bf16.msrb.mxu1 %v3289_v11  ;;  %2127 = vmatpush.bf16.msrb.mxu0 %v3280_v14 }
 0x6fd   :  { %2140 = vmatpush.bf16.msrb.mxu1 %v3288_v15  ;;  %2128 = vmatpush.bf16.msrb.mxu0 %v3279_v18 }
 0x701   :  { %2141 = vmatpush.bf16.msrb.mxu1 %v3287_v56  ;;  %2129 = vmatpush.bf16.msrb.mxu0 %v3278_v31 }
 0x705   :  { %2130 = vmatpush.bf16.msrb.mxu0 %v3277_v32 }
 0x763   :  { %v1825_v62 = vpop.xlane.xlu1 %1824 }
 0x764   :  { %v1829_v63 = vmul.f32 0.0078125, %v1825_v62  ;;  %v3297_v62 = vld [vmem:[%s3943_s18 + $0x20] sm:$0xff] }
 0x765   :  { %v1828_v0 = vpop.xlane.xlu2 %1827  ;;  %2278 = vmatpush.bf16.msrb.mxu2 %v3297_v62 }
 0x766   :  { %v1831_v1 = vmul.f32 %v1829_v63, %v1829_v63  ;;  %v1830_v57 = vmul.f32 0.0078125, %v1828_v0  ;;  %v1833_v21 = vsub.f32 %v3863_v9, %v1829_v63  ;;  %v3286_v9 = vld [vmem:[#allocation12 + $0xc8] sm:$0xff]  ;;  %v3296_v63 = vld [vmem:[%s3943_s18 + $0x18] sm:$0xff]  ;;  %v3295_v0 = vld [vmem:[%s3943_s18 + $0x10] sm:$0xff] }
 0x767   :  { %2142 = vmatpush.bf16.msrb.mxu1 %v3286_v9 }
 0x768   :  { %v1832_v26 = vsub.f32 %v1830_v57, %v1831_v1  ;;  %v3294_v57 = vld [vmem:[%s3943_s18 + $0x8] sm:$0xff] }
 0x769   :  { %2279 = vmatpush.bf16.msrb.mxu2 %v3296_v63 }
 0x76a   :  { %v1834_v6 = vadd.f32 1e-06, %v1832_v26 }
 0x76b   :  { %2143 = vmatpush.bf16.msrb.mxu1 %v3285_v34 }
 0x76c   :  { %3360 = vrsqrt.f32 %v1834_v6  ;;  %vm1841_vm9 = vweird.f32 %v1834_v6 }
 0x76d   :  { %3362 = vpow2.f32 %v3082_v61  ;;  %2280 = vmatpush.bf16.msrb.mxu2 %v3295_v0 }
 0x771   :  { %2281 = vmatpush.bf16.msrb.mxu2 %v3294_v57 }
 0x772   :  { %v3361_v12 = vpop.eup %3360 }
 0x773   :  { %v1836_v13 = vmul.f32 %v3361_v12, %v1834_v6  ;;  %vm1842_vm8 = vweird.f32 %v3361_v12  ;;  %v3363_v1 = vpop.eup %3362 }
 0x774   :  { %vm1843_vm10 = vmor %vm1841_vm9, %vm1842_vm8  ;;  %v2187_v2 = vadd.f32 1.0, %v3363_v1 }
 0x775   :  { %v1837_v16 = vmul.f32 %v3361_v12, %v1836_v13  ;;  %2282 = vmatpush.bf16.msrb.mxu2 %v3293_v4 }
 0x776   :  { %3364 = vrcp.f32 %v2187_v2  ;;  %vm2193_vm15 = vweird.f32 %v2187_v2 }
 0x777   :  { %v1838_v17 = vmul.f32 0.5, %v1837_v16 }
 0x779   :  { %v1839_v19 = vsub.f32 1.5, %v1838_v17 }
 0x77b   :  { %v1840_v20 = vmul.f32 %v3361_v12, %v1839_v19 }
 0x77c   :  { %v3365_v11 = vpop.eup %3364 }
 0x77d   :  { %v1844_v23 = vsel %vm1843_vm10, %v3361_v12, %v1840_v20  ;;  %v2189_v12 = vmul.f32 %v3365_v11, %v2187_v2  ;;  %vm2194_vm14 = vweird.f32 %v3365_v11 }
 0x77e   :  { %v1845_v24 = vmul.f32 %v1844_v23, %v1833_v21  ;;  %v3340_v21 = vld [vmem:[%s3941_s16 + $0x5] ss:$0 sm:$0xff]  ;;  %vm2195_vm0 = vmor %vm2193_vm15, %vm2194_vm14 }
 0x77f   :  { %v2190_v15 = vsub.f32 1.0, %v2189_v12 }
 0x780   :  { %v1849_v28 = vmul.f32 %v3337_v22, %v1845_v24  ;;  %v2199_v24 = vand.u32 2147483648, %v2187_v2 }
 0x781   :  { %v2191_v18 = vmul.f32 %v3365_v11, %v2190_v15 }
 0x782   :  { %v1853_v29 = vadd.f32 %v3338_v25, %v1849_v28  ;;  %v3341_v28 = vld [vmem:[%s3942_s17 + $0x5] ss:$0 sm:$0xff]  ;;  %v2200_v9 = vor.u32 1.1754944e-38, %v2199_v24 }
 0x783   :  { %v2192_v22 = vadd.f32 %v3365_v11, %v2191_v18 }
 0x784   :  { %v1871_v30 = vpack.c.bf16 %v1853_v29, %v1853_v29 }
 0x785   :  { %v2196_v31 = vsel %vm2195_vm0, %v3365_v11, %v2192_v22 }
 0x786   :  { %1967 = vmatmul.bf16.vlgmr.msra.gmra.mxu2 %v1871_v30  ;;  %1980 = vmatmul.bf16.vlgmr.msra.gmra.mxu3 %v1871_v30 }
 0x809   :  { %v1968_v38 = vpop.f32.mrf.mxu2  ;;  %v1981_v39 = vpop.f32.mrf.mxu3 }
 0x80a   :  { %v1969_v40 = vadd.f32 %v1968_v38, %v1875_v36  ;;  %v1982_v41 = vadd.f32 %v1981_v39, %v1876_v37  ;;  %v3342_v39 = vld [vmem:[%s3944_s19] ss:$0 sm:$0xff]  ;;  %s3969_s19 = sld [smem:[#allocation27_spill]] }
 0x80c   :  { %v1985_v42 = vmax.f32 %v1969_v40, 0.0  ;;  %v1986_v43 = vmax.f32 %v1982_v41, 0.0 }
 0x80e   :  { %v2020_v44 = vpack.c.bf16 %v1985_v42, %v1985_v42  ;;  %v2021_v45 = vpack.c.bf16 %v1986_v43, %v1986_v43 }
 0x810   :  { %2131 = vmatmul.bf16.vlgmr.msrb.gmra.mxu0 %v2020_v44  ;;  %2144 = vmatmul.bf16.vlgmr.msrb.gmra.mxu1 %v2021_v45 }
 0x811   :  { %v1970_v46 = vpop.f32.mrf.mxu2  ;;  %v1983_v48 = vpop.f32.mrf.mxu3 }
 0x88d   :  { %v2132_v33 = vpop.f32.mrf.mxu0  ;;  %v2145_v51 = vpop.f32.mrf.mxu1 }
 0x88e   :  { %v2133_v52 = vadd.f32 %v3339_v49, %v2132_v33 }
 0x890   :  { %v2146_v53 = vadd.f32 %v2145_v51, %v2133_v52 }
 0x892   :  { %v2149_v54 = vadd.f32 %v2146_v53, %v1853_v29  ;;  %v2197_v29 = vand.u32 2147483647, %v2187_v2  ;;  %v3343_v53 = vld [vmem:[%s3969_s19] ss:$0 sm:$0xff] }
 0x894   :  { %2154 = vadd.xlane.f32.xlu0 %v2149_v54  ;;  %v2156_v55 = vmul.f32 %v2149_v54, %v2149_v54  ;;  %vm2198_vm1 = vcmp.eq.f32.partialorder %v2197_v29, 8.507059e+37 }
 0x895   :  { %v2134_v27 = vpop.f32.mrf.mxu0  ;;  %v2147_v58 = vpop.f32.mrf.mxu1  ;;  %v2201_v34 = vsel %vm2198_vm1, %v2200_v9, %v2196_v31 }
 0x896   :  { %2157 = vadd.xlane.f32.xlu1 %v2156_v55 }
 0x907   :  { %v2155_v3 = vpop.xlane.xlu0 %2154 }
 0x908   :  { %v2159_v26 = vmul.f32 0.0078125, %v2155_v3 }
 0x909   :  { %v2158_v5 = vpop.xlane.xlu1 %2157 }
 0x90a   :  { %v2161_v6 = vmul.f32 %v2159_v26, %v2159_v26  ;;  %v2160_v7 = vmul.f32 0.0078125, %v2158_v5  ;;  %v2163_v20 = vsub.f32 %v2149_v54, %v2159_v26 }
 0x90c   :  { %v2162_v8 = vsub.f32 %v2160_v7, %v2161_v6 }
 0x90e   :  { %v2164_v10 = vadd.f32 1e-06, %v2162_v8 }
 0x910   :  { %3366 = vrsqrt.f32 %v2164_v10  ;;  %vm2171_vm12 = vweird.f32 %v2164_v10 }
 0x916   :  { %v3367_v13 = vpop.eup %3366 }
 0x917   :  { %v2166_v14 = vmul.f32 %v3367_v13, %v2164_v10  ;;  %vm2172_vm11 = vweird.f32 %v3367_v13 }
 0x918   :  { %vm2173_vm13 = vmor %vm2171_vm12, %vm2172_vm11 }
 0x919   :  { %v2167_v16 = vmul.f32 %v3367_v13, %v2166_v14 }
 0x91b   :  { %v2168_v17 = vmul.f32 0.5, %v2167_v16 }
 0x91d   :  { %v2169_v56 = vsub.f32 1.5, %v2168_v17 }
 0x91f   :  { %v2170_v19 = vmul.f32 %v3367_v13, %v2169_v56 }
 0x921   :  { %v2174_v23 = vsel %vm2173_vm13, %v3367_v13, %v2170_v19 }
 0x922   :  { %v2175_v25 = vmul.f32 %v2174_v23, %v2163_v20 }
 0x924   :  { %v2179_v30 = vmul.f32 %v3340_v21, %v2175_v25 }
 0x926   :  { %v2183_v32 = vadd.f32 %v3341_v28, %v2179_v30 }
 0x928   :  { %v2203_v35 = vmul.f32 %v2201_v34, %v2183_v32  ;;  %v2204_v36 = vadd.f32 %v2183_v32, %v3849_v50 }
 0x92a   :  { %v2205_v37 = vadd.f32 %v2204_v36, %v2203_v35 }
 0x92c   :  { %v2222_v38 = vpack.c.bf16 %v2205_v37, %v2205_v37 }
 0x92e   :  { %2283 = vmatmul.bf16.vlgmr.msrb.gmra.mxu2 %v2222_v38 }
 0x9b1   :  { %v2284_v40 = vpop.f32.mrf.mxu2 }
 0x9b2   :  { %v2285_v41 = vadd.f32 %v3342_v39, %v2284_v40 }
 0x9b4   :  { %v3115_v42 = vmul.f32 -1.442695, %v2285_v41 }
 0x9b6   :  { %3368 = vpow2.f32 %v3115_v42 }
 0x9b9   :  { %v2286_v43 = vpop.f32.mrf.mxu2 }
 0x9bc   :  { %v3369_v44 = vpop.eup %3368 }
 0x9bd   :  { %v2291_v45 = vadd.f32 1.0, %v3369_v44 }
 0x9bf   :  { %3370 = vrcp.f32 %v2291_v45  ;;  %v2303_v33 = vand.u32 2147483648, %v2291_v45  ;;  %v2301_v51 = vand.u32 2147483647, %v2291_v45  ;;  %vm2297_vm3 = vweird.f32 %v2291_v45 }
 0x9c1   :  { %v2304_v54 = vor.u32 1.1754944e-38, %v2303_v33  ;;  %vm2302_vm5 = vcmp.eq.f32.partialorder %v2301_v51, 8.507059e+37 }
 0x9c5   :  { %v3371_v46 = vpop.eup %3370 }
 0x9c6   :  { %v2293_v48 = vmul.f32 %v3371_v46, %v2291_v45  ;;  %vm2298_vm2 = vweird.f32 %v3371_v46 }
 0x9c7   :  { %vm2299_vm4 = vmor %vm2297_vm3, %vm2298_vm2 }
 0x9c8   :  { %v2294_v49 = vsub.f32 1.0, %v2293_v48 }
 0x9ca   :  { %v2295_v50 = vmul.f32 %v3371_v46, %v2294_v49 }
 0x9cc   :  { %v2296_v52 = vadd.f32 %v3371_v46, %v2295_v50 }
 0x9ce   :  { %v2300_v55 = vsel %vm2299_vm4, %v3371_v46, %v2296_v52 }
 0x9cf   :  { %v2305_v27 = vsel %vm2302_vm5, %v2304_v54, %v2300_v55 }
 0x9d0   :  { %v2311_v58 = vmul.f32 %v3343_v53, %v2305_v27 }
 0x9d2   :  { %v2313_v59 = vsel %vm2312_vm6, %v2311_v58, 0.0 }
 0x9d3   :  { %2314 = vadd.xlane.f32.xlu2 %v2313_v59 }
 0xa46   :  { %v2315_v60 = vpop.xlane.xlu2 %2314 }
 0xa47   :  { %v2318_v61 = vadd.f32 %v2317_v47, %v2315_v60 }
 0xa49   :  { %v3116_v62 = vmul.f32 -1.442695, %v2318_v61 }
 0xa4b   :  { %3372 = vpow2.f32 %v3116_v62 }
 0xa51   :  { %v3373_v63 = vpop.eup %3372 }
 0xa52   :  { %v2322_v0 = vadd.f32 1.0, %v3373_v63 }
 0xa54   :  { %3374 = vrcp.f32 %v2322_v0  ;;  %v2334_v3 = vand.u32 2147483648, %v2322_v0  ;;  %v2332_v4 = vand.u32 2147483647, %v2322_v0  ;;  %vm2328_vm8 = vweird.f32 %v2322_v0 }
 0xa56   :  { %v2335_v6 = vor.u32 1.1754944e-38, %v2334_v3  ;;  %vm2333_vm10 = vcmp.eq.f32.partialorder %v2332_v4, 8.507059e+37 }
 0xa5a   :  { %v3375_v1 = vpop.eup %3374 }
 0xa5b   :  { %v2324_v57 = vmul.f32 %v3375_v1, %v2322_v0  ;;  %vm2329_vm7 = vweird.f32 %v3375_v1 }
 0xa5c   :  { %vm2330_vm9 = vmor %vm2328_vm8, %vm2329_vm7 }
 0xa5d   :  { %v2325_v2 = vsub.f32 1.0, %v2324_v57 }
 0xa5f   :  { %v2326_v26 = vmul.f32 %v3375_v1, %v2325_v2 }
 0xa61   :  { %v2327_v5 = vadd.f32 %v3375_v1, %v2326_v26 }
 0xa63   :  { %v2331_v7 = vsel %vm2330_vm9, %v3375_v1, %v2327_v5 }
 0xa64   :  { %v2336_v8 = vsel %vm2333_vm10, %v2335_v6, %v2331_v7 }
 0xa65   :  { %v2338_v10 = vmul.f32 %v2336_v8, %v2205_v37 }
 0xa67   :  { %2339 = vst [vmem:[#allocation14] sm:$0xff] %v2338_v10 }
 0xa68   :  { %2350 = dma.vmem_to_hbm [thread:$0]  %s2346_s12, 128, %s2348_s28, [#allocation5]  }
 0xa69   :  { %3552 = dma.done.wait [#allocation5], 128  }
 0xa6a   :  { %3553 = vsyncadd [#allocation5], 4294967168 }
 0xa6b   :  { %2355 = vsyncpa [#allocation4], 1 }
 0xa6c   :  { %2356 = vsyncpa [#allocation7], 1 }
 0xa6d   :  { %2357 = vsyncpa [#allocation10], 1 }
 0xa6e   :  { %2358 = vsyncpa [#allocation13], 1 }
 0xa6f   :  { %2359 = vsyncpa [#allocation5], 1 }

</bundles_post_ra>
